<compile_context>
chip_gen: v6e
topology: v6e:2x2x1
jax: 0.10.0
libtpu: 0.0.40
codegen_flags: <defaults>
</compile_context>

<pallas_src>
import jax
import jax.numpy as jnp
from jax.experimental import pallas as pl
from jax.experimental.pallas import tpu as pltpu

NUMERIC_DIM = 8
SEM_DIM = 768                       # fixed by the module (Linear(768 * 2, hidden))
HIDDEN = 32
NUM_MEASURES = 4
INPUT_DIM = NUMERIC_DIM + 2 + 2 * SEM_DIM        # 1546 (original w1 fan-in)

NF_PAD = 128                        # lane-padded "numeric feature" block
LEN_LANE = NUMERIC_DIM              # 8  : |len1-len2|
COS_LANE = NUMERIC_DIM + 1          # 9  : cosine similarity (filled in-kernel)
ONE_LANE = NUMERIC_DIM + 2          # 10 : constant 1.0 (carries the biases)

X_DIM = 2 * SEM_DIM + NF_PAD        # 1664 : rows of the fused first-layer weight
Z_DIM = HIDDEN + NUM_MEASURES * HIDDEN   # 160 : [h1 (32) | hs (4*32)]
OUT_LANES = 128                     # lane-dense output slab


def _round_up(x, m):
    return (x + m - 1) // m * m


# --------------------------------------------------------------------------
# Kernel
# --------------------------------------------------------------------------
def _selector_kernel(s1_ref, s2_ref, nf_ref, wbig_ref, wsec_ref, bsec_ref, out_ref):
    s1 = s1_ref[...]                                   # (tm, SEM_DIM)
    s2 = s2_ref[...]                                   # (tm, SEM_DIM)
    nf = nf_ref[...]                                   # (tm, NF_PAD)

    # F.cosine_similarity(sem1, sem2, dim=-1), per-norm eps clamp like PyTorch.
    eps = jnp.float32(1e-8)
    dot = jnp.sum(s1 * s2, axis=-1, keepdims=True)
    n1 = jnp.maximum(jnp.sqrt(jnp.sum(s1 * s1, axis=-1, keepdims=True)), eps)
    n2 = jnp.maximum(jnp.sqrt(jnp.sum(s2 * s2, axis=-1, keepdims=True)), eps)
    cos = dot / (n1 * n2)                              # (tm, 1)

    # Insert the cosine feature on its reserved lane of the numeric block.
    lane = jax.lax.broadcasted_iota(jnp.int32, nf.shape, 1)
    nf = jnp.where(lane == COS_LANE, jnp.broadcast_to(cos, nf.shape), nf)

    # Fused first layer: z = [feature-extractor h1 (32) | sim-head hs (128)].
    # Biases enter through the constant-1 lane of nf; ReLU applies to both parts.
    z = (jnp.dot(s1, wbig_ref[0:SEM_DIM, :], preferred_element_type=jnp.float32)
         + jnp.dot(s2, wbig_ref[SEM_DIM:2 * SEM_DIM, :], preferred_element_type=jnp.float32)
         + jnp.dot(nf, wbig_ref[2 * SEM_DIM:X_DIM, :], preferred_element_type=jnp.float32))
    z = jnp.maximum(z, 0.0)                            # (tm, Z_DIM)

    # Fused second layer: [selector logits (4) | sim-head outputs (4)].
    out8 = jnp.dot(z, wsec_ref[...], preferred_element_type=jnp.float32) + bsec_ref[...]
    logits = out8[:, 0:NUM_MEASURES]
    sims = out8[:, NUM_MEASURES:2 * NUM_MEASURES]

    m = jnp.max(logits, axis=-1, keepdims=True)
    e = jnp.exp(logits - m)
    wts = e / jnp.sum(e, axis=-1, keepdims=True)       # softmax(dim=-1)
    wsum = jnp.sum(wts * sims, axis=-1, keepdims=True)

    pad = jnp.zeros((wts.shape[0], OUT_LANES - 2 * NUM_MEASURES - 1), jnp.float32)
    out_ref[...] = jnp.concatenate([wts, sims, wsum, pad], axis=-1)


def _build_call(tm, b_pad):
    grid = (b_pad // tm,)
    return pl.pallas_call(
        _selector_kernel,
        out_shape=jax.ShapeDtypeStruct((b_pad, OUT_LANES), jnp.float32),
        grid=grid,
        in_specs=[
            pl.BlockSpec((tm, SEM_DIM), lambda i: (i, 0)),                 # s1
            pl.BlockSpec((tm, SEM_DIM), lambda i: (i, 0)),                 # s2
            pl.BlockSpec((tm, NF_PAD), lambda i: (i, 0)),                  # numeric block
            pl.BlockSpec((X_DIM, Z_DIM), lambda i: (0, 0)),                # fused layer-1 W
            pl.BlockSpec((Z_DIM, 2 * NUM_MEASURES), lambda i: (0, 0)),     # fused layer-2 W
            pl.BlockSpec((1, 2 * NUM_MEASURES), lambda i: (0, 0)),         # fused layer-2 b
        ],
        out_specs=pl.BlockSpec((tm, OUT_LANES), lambda i: (i, 0)),
        compiler_params=pltpu.CompilerParams(dimension_semantics=("parallel",)),
    )


# --------------------------------------------------------------------------
# Parameters
# --------------------------------------------------------------------------
def init_params(key):
    """Deterministic PyTorch-style (uniform +-1/sqrt(fan_in)) init + fusing."""
    def lin(k, fan_in, fan_out):
        kw, kb = jax.random.split(k)
        bound = 1.0 / (fan_in ** 0.5)
        w = jax.random.uniform(kw, (fan_in, fan_out), jnp.float32, -bound, bound)
        b = jax.random.uniform(kb, (1, fan_out), jnp.float32, -bound, bound)
        return w, b

    ks = jax.random.split(key, 3 + 2 * NUM_MEASURES)
    raw = {}
    raw['w1'], raw['b1'] = lin(ks[0], INPUT_DIM, HIDDEN)
    raw['w2'], raw['b2'] = lin(ks[1], HIDDEN, HIDDEN // 2)
    raw['wsel'], raw['bsel'] = lin(ks[2], HIDDEN // 2, NUM_MEASURES)
    raw['sim'] = []
    for m in range(NUM_MEASURES):
        wA, bA = lin(ks[3 + 2 * m], 2 * SEM_DIM, HIDDEN)
        wB, bB = lin(ks[4 + 2 * m], HIDDEN, 1)
        raw['sim'].append((wA, bA, wB, bB))

    # ---- fused first layer: rows follow x = [s1(768) | s2(768) | nf(128)] ----
    w1 = raw['w1']                                                       # (1546, 32)
    wsim1 = jnp.concatenate([s[0] for s in raw['sim']], axis=1)          # (1536, 128)
    bsim1 = jnp.concatenate([s[1] for s in raw['sim']], axis=1)          # (1, 128)

    w_big = jnp.zeros((X_DIM, Z_DIM), jnp.float32)
    w_big = w_big.at[0:2 * SEM_DIM, 0:HIDDEN].set(w1[NUMERIC_DIM + 2:, :])   # semantic rows
    w_big = w_big.at[0:2 * SEM_DIM, HIDDEN:Z_DIM].set(wsim1)
    # nf lanes 0..9 map 1:1 to w1 rows 0..9 (numeric, strlen, cos)
    w_big = w_big.at[2 * SEM_DIM:2 * SEM_DIM + NUMERIC_DIM + 2, 0:HIDDEN].set(
        w1[0:NUMERIC_DIM + 2, :])
    # biases ride on the constant-1 lane
    w_big = w_big.at[2 * SEM_DIM + ONE_LANE, 0:HIDDEN].set(raw['b1'][0])
    w_big = w_big.at[2 * SEM_DIM + ONE_LANE, HIDDEN:Z_DIM].set(bsim1[0])

    # ---- fused second layer: selector folded into layer 2 + block-diag sims ----
    wsel_f = raw['w2'] @ raw['wsel']                       # (32, 4)
    bsel_f = raw['b2'] @ raw['wsel'] + raw['bsel']         # (1, 4)
    w_sec = jnp.zeros((Z_DIM, 2 * NUM_MEASURES), jnp.float32)
    b_sec = jnp.zeros((1, 2 * NUM_MEASURES), jnp.float32)
    w_sec = w_sec.at[0:HIDDEN, 0:NUM_MEASURES].set(wsel_f)
    b_sec = b_sec.at[0, 0:NUM_MEASURES].set(bsel_f[0])
    for m in range(NUM_MEASURES):
        wB, bB = raw['sim'][m][2], raw['sim'][m][3]
        w_sec = w_sec.at[HIDDEN + m * HIDDEN:HIDDEN + (m + 1) * HIDDEN,
                         NUM_MEASURES + m].set(wB[:, 0])
        b_sec = b_sec.at[0, NUM_MEASURES + m].set(bB[0, 0])

    fused = {'w_big': w_big, 'w_sec': w_sec, 'b_sec': b_sec}
    return raw, fused


# --------------------------------------------------------------------------
# Wrappers
# --------------------------------------------------------------------------
def forward_batch(fused, numeric1, semantic1, lens1, numeric2, semantic2, lens2,
                  *, tile_m=256):
    """Batched forward over B pairs. lens* are float string lengths (host-side)."""
    B = semantic1.shape[0]
    tm = min(tile_m, _round_up(max(B, 1), 8))
    b_pad = _round_up(B, tm)

    num_diff = jnp.abs(numeric1 - numeric2).astype(jnp.float32)      # (B, 8)
    len_diff = jnp.abs(lens1 - lens2).astype(jnp.float32)[:, None]   # (B, 1)
    nf = jnp.concatenate(
        [num_diff, len_diff,
         jnp.zeros((B, 1), jnp.float32),          # cosine slot (filled in-kernel)
         jnp.ones((B, 1), jnp.float32),           # constant-1 lane (carries biases)
         jnp.zeros((B, NF_PAD - ONE_LANE - 1), jnp.float32)], axis=-1)

    def pad_rows(a):
        return a if b_pad == B else jnp.pad(a, ((0, b_pad - B), (0, 0)))

    out = _build_call(tm, b_pad)(
        pad_rows(semantic1.astype(jnp.float32)),
        pad_rows(semantic2.astype(jnp.float32)),
        pad_rows(nf),
        fused['w_big'], fused['w_sec'], fused['b_sec'])

    wts = out[:B, 0:NUM_MEASURES]
    sims = out[:B, NUM_MEASURES:2 * NUM_MEASURES]
    wsum = out[:B, 2 * NUM_MEASURES]
    return wsum, wts, sims


def forward(fused, repr1, repr2):
    """Single-pair API matching the PyTorch module's forward(repr1, repr2)."""
    # TODO(synk): string length diff is computed host-side with Python len(),
    # exactly as the PyTorch module does (strings have no array representation).
    l1 = jnp.asarray([float(len(repr1['string']))], jnp.float32)
    l2 = jnp.asarray([float(len(repr2['string']))], jnp.float32)
    wsum, wts, sims = forward_batch(
        fused,
        repr1['numeric'][None, :], repr1['semantic'][None, :], l1,
        repr2['numeric'][None, :], repr2['semantic'][None, :], l2)
    return wsum[0], wts[0], sims[0]


# --------------------------------------------------------------------------
# Pure-JAX reference (faithful transcription of the PyTorch forward)
# --------------------------------------------------------------------------
def reference_batch(raw, num1, sem1, len1, num2, sem2, len2):
    eps = 1e-8
    numeric_diff = jnp.abs(num1 - num2)
    slen = jnp.abs(len1 - len2)[:, None]
    dot = jnp.sum(sem1 * sem2, axis=-1, keepdims=True)
    n1 = jnp.maximum(jnp.linalg.norm(sem1, axis=-1, keepdims=True), eps)
    n2 = jnp.maximum(jnp.linalg.norm(sem2, axis=-1, keepdims=True), eps)
    cos = dot / (n1 * n2)
    feat = jnp.concatenate([numeric_diff, slen, cos, sem1, sem2], axis=-1)
    h1 = jnp.maximum(feat @ raw['w1'] + raw['b1'], 0.0)
    h2 = h1 @ raw['w2'] + raw['b2']
    wts = jax.nn.softmax(h2 @ raw['wsel'] + raw['bsel'], axis=-1)
    combined = jnp.concatenate([sem1, sem2], axis=-1)
    sims = jnp.concatenate(
        [jnp.maximum(combined @ wA + bA, 0.0) @ wB + bB
         for (wA, bA, wB, bB) in raw['sim']], axis=-1)
    return jnp.sum(wts * sims, axis=-1), wts, sims


if __name__ == "__main__":
    key = jax.random.PRNGKey(0)
    kp, kd = jax.random.split(key)
    raw, fused = init_params(kp)

    B = 16
    kn1, ks1, kn2, ks2 = jax.random.split(kd, 4)
    numeric1 = jax.random.normal(kn1, (B, NUMERIC_DIM), jnp.float32)
    semantic1 = jax.random.normal(ks1, (B, SEM_DIM), jnp.float32)
    numeric2 = jax.random.normal(kn2, (B, NUMERIC_DIM), jnp.float32)
    semantic2 = jax.random.normal(ks2, (B, SEM_DIM), jnp.float32)
    strings1 = ['x' * (3 + (7 * i) % 23) for i in range(B)]
    strings2 = ['y' * (5 + (11 * i) % 17) for i in range(B)]
    lens1 = jnp.asarray([float(len(s)) for s in strings1], jnp.float32)
    lens2 = jnp.asarray([float(len(s)) for s in strings2], jnp.float32)

    # batched kernel call
    wsum, wts, sims = forward_batch(fused, numeric1, semantic1, lens1,
                                    numeric2, semantic2, lens2)
    jax.block_until_ready((wsum, wts, sims))

    ref_wsum, ref_wts, ref_sims = reference_batch(
        raw, numeric1, semantic1, lens1, numeric2, semantic2, lens2)
    assert jnp.allclose(wts, ref_wts, rtol=1e-3, atol=1e-3)
    assert jnp.allclose(sims, ref_sims, rtol=1e-3, atol=1e-3)
    assert jnp.allclose(wsum, ref_wsum, rtol=1e-3, atol=1e-3)

    # single-pair API (same semantics as the PyTorch module's forward)
    repr1 = {'numeric': numeric1[0], 'semantic': semantic1[0], 'string': strings1[0]}
    repr2 = {'numeric': numeric2[0], 'semantic': semantic2[0], 'string': strings2[0]}
    s_wsum, s_wts, s_sims = forward(fused, repr1, repr2)
    jax.block_until_ready((s_wsum, s_wts, s_sims))
    assert jnp.allclose(s_wsum, ref_wsum[0], rtol=1e-3, atol=1e-3)
    assert jnp.allclose(s_wts, ref_wts[0], rtol=1e-3, atol=1e-3)
    assert jnp.allclose(s_sims, ref_sims[0], rtol=1e-3, atol=1e-3)

    print("KERNEL_OK")
</pallas_src>

<mosaic_0001>
module attributes {stable_mosaic.version = 11 : i64} {
  func.func @_selector_kernel(%arg0: i32, %arg1: memref<16x768xf32, #tpu.memory_space<vmem>>, %arg2: memref<16x768xf32, #tpu.memory_space<vmem>>, %arg3: memref<16x128xf32, #tpu.memory_space<vmem>>, %arg4: memref<1664x160xf32, #tpu.memory_space<vmem>>, %arg5: memref<160x8xf32, #tpu.memory_space<vmem>>, %arg6: memref<1x8xf32, #tpu.memory_space<vmem>>, %arg7: memref<16x128xf32, #tpu.memory_space<vmem>>) attributes {dimension_semantics = [#tpu.dimension_semantics<parallel>], iteration_bounds = array<i64: 1>, scalar_prefetch = 0 : i64, scratch_operands = 0 : i64, tpu.core_type = #tpu.core_type<tc>, window_params = [{transform_indices = @transform_0, window_bounds = array<i64: 16, 768>}, {transform_indices = @transform_1, window_bounds = array<i64: 16, 768>}, {transform_indices = @transform_2, window_bounds = array<i64: 16, 128>}, {pipeline_mode = #tpu.pipeline_mode<synchronous>, transform_indices = @transform_3, window_bounds = array<i64: 1664, 160>}, {pipeline_mode = #tpu.pipeline_mode<synchronous>, transform_indices = @transform_4, window_bounds = array<i64: 160, 8>}, {pipeline_mode = #tpu.pipeline_mode<synchronous>, transform_indices = @transform_5, window_bounds = array<i64: 1, 8>}, {transform_indices = @transform_6, window_bounds = array<i64: 16, 128>}]} {
    %c0 = arith.constant 0 : index
    %c0_0 = arith.constant 0 : index
    %0 = vector.load %arg1[%c0, %c0_0] : memref<16x768xf32, #tpu.memory_space<vmem>>, vector<16x768xf32>
    %c0_1 = arith.constant 0 : index
    %c0_2 = arith.constant 0 : index
    %1 = vector.load %arg2[%c0_1, %c0_2] : memref<16x768xf32, #tpu.memory_space<vmem>>, vector<16x768xf32>
    %c0_3 = arith.constant 0 : index
    %c0_4 = arith.constant 0 : index
    %2 = vector.load %arg3[%c0_3, %c0_4] : memref<16x128xf32, #tpu.memory_space<vmem>>, vector<16x128xf32>
    %3 = arith.mulf %0, %1 : vector<16x768xf32>
    %cst = arith.constant dense<0.000000e+00> : vector<16xf32>
    %4 = vector.multi_reduction <add>, %3, %cst [1] : vector<16x768xf32> to vector<16xf32>
    %5 = vector.shape_cast %4 : vector<16xf32> to vector<16x1xf32>
    %6 = arith.mulf %0, %0 : vector<16x768xf32>
    %cst_5 = arith.constant dense<0.000000e+00> : vector<16xf32>
    %7 = vector.multi_reduction <add>, %6, %cst_5 [1] : vector<16x768xf32> to vector<16xf32>
    %8 = vector.shape_cast %7 : vector<16xf32> to vector<16x1xf32>
    %9 = math.sqrt %8 : vector<16x1xf32>
    %cst_6 = arith.constant 9.99999993E-9 : f32
    %10 = vector.broadcast %cst_6 : f32 to vector<16x1xf32>
    %11 = arith.maximumf %9, %10 : vector<16x1xf32>
    %12 = arith.mulf %1, %1 : vector<16x768xf32>
    %cst_7 = arith.constant dense<0.000000e+00> : vector<16xf32>
    %13 = vector.multi_reduction <add>, %12, %cst_7 [1] : vector<16x768xf32> to vector<16xf32>
    %14 = vector.shape_cast %13 : vector<16xf32> to vector<16x1xf32>
    %15 = math.sqrt %14 : vector<16x1xf32>
    %cst_8 = arith.constant 9.99999993E-9 : f32
    %16 = vector.broadcast %cst_8 : f32 to vector<16x1xf32>
    %17 = arith.maximumf %15, %16 : vector<16x1xf32>
    %18 = arith.mulf %11, %17 : vector<16x1xf32>
    %19 = arith.divf %5, %18 : vector<16x1xf32>
    %20 = tpu.iota {dimensions = array<i32: 1>} : vector<16x128xi32>
    %c9_i32 = arith.constant 9 : i32
    %21 = vector.broadcast %c9_i32 : i32 to vector<16x128xi32>
    %22 = arith.cmpi eq, %20, %21 : vector<16x128xi32>
    %23 = vector.shape_cast %19 : vector<16x1xf32> to vector<16x1xf32>
    %24 = vector.broadcast %23 : vector<16x1xf32> to vector<16x128xf32>
    %25 = arith.select %22, %24, %2 : vector<16x128xi1>, vector<16x128xf32>
    %c0_9 = arith.constant 0 : index
    %c0_10 = arith.constant 0 : index
    %26 = vector.load %arg4[%c0_9, %c0_10] : memref<1664x160xf32, #tpu.memory_space<vmem>>, vector<768x160xf32>
    %cst_11 = arith.constant dense<0.000000e+00> : vector<16x160xf32>
    %27 = tpu.matmul %0, %26, %cst_11 {dimension_numbers = #tpu.dot_dimension_numbers<[1], [0], [0], [1], [0, 0, 1, 1], [], []>} : vector<16x768xf32>, vector<768x160xf32>, vector<16x160xf32> -> vector<16x160xf32>
    %c768 = arith.constant 768 : index
    %c0_12 = arith.constant 0 : index
    %28 = vector.load %arg4[%c768, %c0_12] : memref<1664x160xf32, #tpu.memory_space<vmem>>, vector<768x160xf32>
    %cst_13 = arith.constant dense<0.000000e+00> : vector<16x160xf32>
    %29 = tpu.matmul %1, %28, %cst_13 {dimension_numbers = #tpu.dot_dimension_numbers<[1], [0], [0], [1], [0, 0, 1, 1], [], []>} : vector<16x768xf32>, vector<768x160xf32>, vector<16x160xf32> -> vector<16x160xf32>
    %30 = arith.addf %27, %29 : vector<16x160xf32>
    %c1536 = arith.constant 1536 : index
    %c0_14 = arith.constant 0 : index
    %31 = vector.load %arg4[%c1536, %c0_14] : memref<1664x160xf32, #tpu.memory_space<vmem>>, vector<128x160xf32>
    %cst_15 = arith.constant dense<0.000000e+00> : vector<16x160xf32>
    %32 = tpu.matmul %25, %31, %cst_15 {dimension_numbers = #tpu.dot_dimension_numbers<[1], [0], [0], [1], [0, 0, 1, 1], [], []>} : vector<16x128xf32>, vector<128x160xf32>, vector<16x160xf32> -> vector<16x160xf32>
    %33 = arith.addf %30, %32 : vector<16x160xf32>
    %cst_16 = arith.constant 0.000000e+00 : f32
    %34 = vector.broadcast %cst_16 : f32 to vector<16x160xf32>
    %35 = arith.maximumf %33, %34 : vector<16x160xf32>
    %c0_17 = arith.constant 0 : index
    %c0_18 = arith.constant 0 : index
    %36 = vector.load %arg5[%c0_17, %c0_18] : memref<160x8xf32, #tpu.memory_space<vmem>>, vector<160x8xf32>
    %cst_19 = arith.constant dense<0.000000e+00> : vector<16x8xf32>
    %37 = tpu.matmul %35, %36, %cst_19 {dimension_numbers = #tpu.dot_dimension_numbers<[1], [0], [0], [1], [0, 0, 1, 1], [], []>} : vector<16x160xf32>, vector<160x8xf32>, vector<16x8xf32> -> vector<16x8xf32>
    %c0_20 = arith.constant 0 : index
    %c0_21 = arith.constant 0 : index
    %38 = vector.load %arg6[%c0_20, %c0_21] : memref<1x8xf32, #tpu.memory_space<vmem>>, vector<1x8xf32>
    %39 = vector.broadcast %38 : vector<1x8xf32> to vector<16x8xf32>
    %40 = arith.addf %37, %39 : vector<16x8xf32>
    %41 = vector.extract_strided_slice %40 {offsets = [0, 0], sizes = [16, 4], strides = [1, 1]} : vector<16x8xf32> to vector<16x4xf32>
    %42 = vector.extract_strided_slice %40 {offsets = [0, 4], sizes = [16, 4], strides = [1, 1]} : vector<16x8xf32> to vector<16x4xf32>
    %cst_22 = arith.constant dense<0xFF800000> : vector<16xf32>
    %43 = vector.multi_reduction <maximumf>, %41, %cst_22 [1] : vector<16x4xf32> to vector<16xf32>
    %44 = vector.shape_cast %43 : vector<16xf32> to vector<16x1xf32>
    %45 = vector.broadcast %44 : vector<16x1xf32> to vector<16x4xf32>
    %46 = arith.subf %41, %45 : vector<16x4xf32>
    %47 = math.exp %46 : vector<16x4xf32>
    %cst_23 = arith.constant dense<0.000000e+00> : vector<16xf32>
    %48 = vector.multi_reduction <add>, %47, %cst_23 [1] : vector<16x4xf32> to vector<16xf32>
    %49 = vector.shape_cast %48 : vector<16xf32> to vector<16x1xf32>
    %50 = vector.broadcast %49 : vector<16x1xf32> to vector<16x4xf32>
    %51 = arith.divf %47, %50 : vector<16x4xf32>
    %52 = arith.mulf %51, %42 : vector<16x4xf32>
    %cst_24 = arith.constant dense<0.000000e+00> : vector<16xf32>
    %53 = vector.multi_reduction <add>, %52, %cst_24 [1] : vector<16x4xf32> to vector<16xf32>
    %54 = vector.shape_cast %53 : vector<16xf32> to vector<16x1xf32>
    %cst_25 = arith.constant 0.000000e+00 : f32
    %55 = vector.broadcast %cst_25 : f32 to vector<16x119xf32>
    %56 = tpu.concatenate %51, %42, %54, %55 in 1 : vector<16x4xf32>, vector<16x4xf32>, vector<16x1xf32>, vector<16x119xf32> -> vector<16x128xf32>
    %c0_26 = arith.constant 0 : index
    %c0_27 = arith.constant 0 : index
    %57 = vector.load %arg7[%c0_26, %c0_27] : memref<16x128xf32, #tpu.memory_space<vmem>>, vector<16x128xf32>
    tpu.vector_store %arg7[%c0_26, %c0_27], %56 {strides = array<i32>} : memref<16x128xf32, #tpu.memory_space<vmem>>, vector<16x128xf32>,
    return
  }
  func.func @transform_0(%arg0: i32) -> (i32, i32) {
    %c0_i32 = arith.constant 0 : i32
    %c0_i32_0 = arith.constant 0 : i32
    return %arg0, %c0_i32 : i32, i32
  }
  func.func @transform_1(%arg0: i32) -> (i32, i32) {
    %c0_i32 = arith.constant 0 : i32
    %c0_i32_0 = arith.constant 0 : i32
    return %arg0, %c0_i32 : i32, i32
  }
  func.func @transform_2(%arg0: i32) -> (i32, i32) {
    %c0_i32 = arith.constant 0 : i32
    %c0_i32_0 = arith.constant 0 : i32
    return %arg0, %c0_i32 : i32, i32
  }
  func.func @transform_3(%arg0: i32) -> (i32, i32) {
    %c0_i32 = arith.constant 0 : i32
    %c0_i32_0 = arith.constant 0 : i32
    %c0_i32_1 = arith.constant 0 : i32
    return %c0_i32, %c0_i32_0 : i32, i32
  }
  func.func @transform_4(%arg0: i32) -> (i32, i32) {
    %c0_i32 = arith.constant 0 : i32
    %c0_i32_0 = arith.constant 0 : i32
    %c0_i32_1 = arith.constant 0 : i32
    return %c0_i32, %c0_i32_0 : i32, i32
  }
  func.func @transform_5(%arg0: i32) -> (i32, i32) {
    %c0_i32 = arith.constant 0 : i32
    %c0_i32_0 = arith.constant 0 : i32
    %c0_i32_1 = arith.constant 0 : i32
    return %c0_i32, %c0_i32_0 : i32, i32
  }
  func.func @transform_6(%arg0: i32) -> (i32, i32) {
    %c0_i32 = arith.constant 0 : i32
    %c0_i32_0 = arith.constant 0 : i32
    return %arg0, %c0_i32 : i32, i32
  }
}

</mosaic_0001>

<bundles_post_ra>
// kernel: tpu_custom_call.1
= control target key start
LH: loop header
LB: loop body
LE: loop exit
PB: predicated region body
PF: predicated region fallthrough
CT: control target
= control target key end

     0   :  { %s3046_s0 = inlined_call_operand.vmem [shape: f32[16,768], index: 0, kind: input, shape index: {}]   ;;  %s3047_s1 = inlined_call_operand.vmem [shape: f32[16,768], index: 1, kind: input, shape index: {}]   ;;  %s3048_s2 = inlined_call_operand.vmem [shape: f32[16,128], index: 2, kind: input, shape index: {}]   ;;  %s3049_s3 = inlined_call_operand.vmem [shape: f32[1664,160], index: 3, kind: input, shape index: {}]   ;;  %s3050_s4 = inlined_call_operand.vmem [shape: f32[160,8], index: 4, kind: input, shape index: {}]   ;;  %s3051_s5 = inlined_call_operand.vmem [shape: f32[1,8], index: 5, kind: input, shape index: {}]   ;;  %s3052_s6 = inlined_call_operand.hbm [shape: f32[16,128], index: 6, kind: output, shape index: {}]  }
   0x1   :  { %v394_v0 = vld [vmem:[%s3049_s3 + $0x6f8] sm:$0xff]  ;;  %v393_v2 = vld [vmem:[%s3049_s3 + $0x6f0] sm:$0xff]  ;;  %v392_v4 = vld [vmem:[%s3049_s3 + $0x6e8] sm:$0xff] }
   0x2   :  { %v458_v1 = vld [vmem:[%s3049_s3 + $0x8f8] sm:$0xff]  ;;  %555 = vmatprep.subr.mxu0 %v394_v0  ;;  %v457_v3 = vld [vmem:[%s3049_s3 + $0x8f0] sm:$0xff]  ;;  %v456_v5 = vld [vmem:[%s3049_s3 + $0x8e8] sm:$0xff] }
   0x3   :  { %632 = vmatprep.subr.mxu1 %v458_v1  ;;  %556 = vmatpush1.msra.mxu0 %v393_v2  ;;  %v391_v6 = vld [vmem:[%s3049_s3 + $0x6e0] sm:$0xff]  ;;  %v390_v8 = vld [vmem:[%s3049_s3 + $0x6d8] sm:$0xff]  ;;  %v389_v10 = vld [vmem:[%s3049_s3 + $0x6d0] sm:$0xff] }
   0x4   :  { %633 = vmatpush1.msra.mxu1 %v457_v3  ;;  %v455_v7 = vld [vmem:[%s3049_s3 + $0x8e0] sm:$0xff]  ;;  %557 = vmatprep.subr.mxu0 %v392_v4  ;;  %v454_v9 = vld [vmem:[%s3049_s3 + $0x8d8] sm:$0xff]  ;;  %v453_v11 = vld [vmem:[%s3049_s3 + $0x8d0] sm:$0xff] }
   0x5   :  { %634 = vmatprep.subr.mxu1 %v456_v5  ;;  %558 = vmatpush1.msra.mxu0 %v391_v6  ;;  %v388_v12 = vld [vmem:[%s3049_s3 + $0x6c8] sm:$0xff]  ;;  %v387_v14 = vld [vmem:[%s3049_s3 + $0x6c0] sm:$0xff]  ;;  %v386_v16 = vld [vmem:[%s3049_s3 + $0x6b8] sm:$0xff] }
   0x6   :  { %635 = vmatpush1.msra.mxu1 %v455_v7  ;;  %v452_v13 = vld [vmem:[%s3049_s3 + $0x8c8] sm:$0xff]  ;;  %559 = vmatprep.subr.mxu0 %v390_v8  ;;  %v451_v15 = vld [vmem:[%s3049_s3 + $0x8c0] sm:$0xff]  ;;  %v450_v17 = vld [vmem:[%s3049_s3 + $0x8b8] sm:$0xff] }
   0x7   :  { %636 = vmatprep.subr.mxu1 %v454_v9  ;;  %560 = vmatpush1.msra.mxu0 %v389_v10  ;;  %v385_v18 = vld [vmem:[%s3049_s3 + $0x6b0] sm:$0xff]  ;;  %v384_v20 = vld [vmem:[%s3049_s3 + $0x6a8] sm:$0xff]  ;;  %v383_v22 = vld [vmem:[%s3049_s3 + $0x6a0] sm:$0xff] }
   0x8   :  { %637 = vmatpush1.msra.mxu1 %v453_v11  ;;  %561 = vmatprep.subr.mxu0 %v388_v12  ;;  %v449_v19 = vld [vmem:[%s3049_s3 + $0x8b0] sm:$0xff]  ;;  %v448_v21 = vld [vmem:[%s3049_s3 + $0x8a8] sm:$0xff]  ;;  %v447_v23 = vld [vmem:[%s3049_s3 + $0x8a0] sm:$0xff] }
   0x9   :  { %638 = vmatprep.subr.mxu1 %v452_v13  ;;  %562 = vmatpush1.msra.mxu0 %v387_v14  ;;  %v382_v24 = vld [vmem:[%s3049_s3 + $0x698] sm:$0xff]  ;;  %v381_v26 = vld [vmem:[%s3049_s3 + $0x690] sm:$0xff]  ;;  %v380_v28 = vld [vmem:[%s3049_s3 + $0x688] sm:$0xff] }
   0xa   :  { %639 = vmatpush1.msra.mxu1 %v451_v15  ;;  %563 = vmatprep.subr.mxu0 %v386_v16  ;;  %v446_v25 = vld [vmem:[%s3049_s3 + $0x898] sm:$0xff]  ;;  %v445_v27 = vld [vmem:[%s3049_s3 + $0x890] sm:$0xff]  ;;  %v444_v29 = vld [vmem:[%s3049_s3 + $0x888] sm:$0xff] }
   0xb   :  { %640 = vmatprep.subr.mxu1 %v450_v17  ;;  %564 = vmatpush1.msra.mxu0 %v385_v18  ;;  %v379_v30 = vld [vmem:[%s3049_s3 + $0x680] sm:$0xff]  ;;  %v378_v32 = vld [vmem:[%s3049_s3 + $0x678] sm:$0xff]  ;;  %v377_v34 = vld [vmem:[%s3049_s3 + $0x670] sm:$0xff] }
   0xc   :  { %641 = vmatpush1.msra.mxu1 %v449_v19  ;;  %565 = vmatprep.subr.mxu0 %v384_v20  ;;  %v443_v31 = vld [vmem:[%s3049_s3 + $0x880] sm:$0xff]  ;;  %v442_v33 = vld [vmem:[%s3049_s3 + $0x878] sm:$0xff]  ;;  %v441_v35 = vld [vmem:[%s3049_s3 + $0x870] sm:$0xff] }
   0xd   :  { %642 = vmatprep.subr.mxu1 %v448_v21  ;;  %566 = vmatpush1.msra.mxu0 %v383_v22  ;;  %v376_v36 = vld [vmem:[%s3049_s3 + $0x668] sm:$0xff]  ;;  %v375_v38 = vld [vmem:[%s3049_s3 + $0x660] sm:$0xff]  ;;  %v374_v40 = vld [vmem:[%s3049_s3 + $0x658] sm:$0xff] }
   0xe   :  { %643 = vmatpush1.msra.mxu1 %v447_v23  ;;  %567 = vmatprep.subr.mxu0 %v382_v24  ;;  %v440_v37 = vld [vmem:[%s3049_s3 + $0x868] sm:$0xff]  ;;  %v439_v39 = vld [vmem:[%s3049_s3 + $0x860] sm:$0xff]  ;;  %v438_v41 = vld [vmem:[%s3049_s3 + $0x858] sm:$0xff] }
   0xf   :  { %644 = vmatprep.subr.mxu1 %v446_v25  ;;  %568 = vmatpush1.msra.mxu0 %v381_v26  ;;  %v1539_v42 = vld [vmem:[%s3046_s0] sm:$0xff]  ;;  %v1544_v43 = vld [vmem:[%s3046_s0 + $0x8] sm:$0xff]  ;;  %v1549_v44 = vld [vmem:[%s3046_s0 + $0x10] sm:$0xff] }
  0x10   :  { %645 = vmatpush1.msra.mxu1 %v445_v27  ;;  %569 = vmatprep.subr.mxu0 %v380_v28  ;;  %v373_v45 = vld [vmem:[%s3049_s3 + $0x650] sm:$0xff]  ;;  %v1560_v47 = vld [vmem:[%s3046_s0 + $0x18] sm:$0xff]  ;;  %v76_v48 = vmul.f32 %v1539_v42, %v1539_v42  ;;  %v77_v49 = vmul.f32 %v1544_v43, %v1544_v43  ;;  %v78_v50 = vmul.f32 %v1549_v44, %v1549_v44  ;;  %v372_v51 = vld [vmem:[%s3049_s3 + $0x648] sm:$0xff] }
  0x11   :  { %646 = vmatprep.subr.mxu1 %v444_v29  ;;  %570 = vmatpush1.msra.mxu0 %v379_v30  ;;  %v437_v46 = vld [vmem:[%s3049_s3 + $0x850] sm:$0xff]  ;;  %v436_v52 = vld [vmem:[%s3049_s3 + $0x848] sm:$0xff]  ;;  %v1577_v53 = vld [vmem:[%s3046_s0 + $0x20] sm:$0xff]  ;;  %v79_v57 = vmul.f32 %v1560_v47, %v1560_v47 }
  0x12   :  { %647 = vmatpush1.msra.mxu1 %v443_v31  ;;  %571 = vmatprep.subr.mxu0 %v378_v32  ;;  %v371_v54 = vld [vmem:[%s3049_s3 + $0x640] sm:$0xff]  ;;  %v1588_v56 = vld [vmem:[%s3046_s0 + $0x28] sm:$0xff]  ;;  %v88_v58 = vadd.f32 %v77_v49, %v76_v48  ;;  %v370_v59 = vld [vmem:[%s3049_s3 + $0x638] sm:$0xff]  ;;  %v80_v62 = vmul.f32 %v1577_v53, %v1577_v53 }
  0x13   :  { %648 = vmatprep.subr.mxu1 %v442_v33  ;;  %572 = vmatpush1.msra.mxu0 %v377_v34  ;;  %v435_v55 = vld [vmem:[%s3049_s3 + $0x840] sm:$0xff]  ;;  %v434_v60 = vld [vmem:[%s3049_s3 + $0x838] sm:$0xff]  ;;  %v1601_v61 = vld [vmem:[%s3046_s0 + $0x30] sm:$0xff]  ;;  %v81_v11 = vmul.f32 %v1588_v56, %v1588_v56 }
  0x14   :  { %649 = vmatpush1.msra.mxu1 %v441_v35  ;;  %573 = vmatprep.subr.mxu0 %v376_v36  ;;  %v89_v63 = vadd.f32 %v88_v58, %v78_v50  ;;  %v369_v0 = vld [vmem:[%s3049_s3 + $0x630] sm:$0xff]  ;;  %v1614_v2 = vld [vmem:[%s3046_s0 + $0x38] sm:$0xff]  ;;  %v1619_v3 = vld [vmem:[%s3046_s0 + $0x40] sm:$0xff]  ;;  %v82_v5 = vmul.f32 %v1601_v61, %v1601_v61 }
  0x15   :  { %650 = vmatprep.subr.mxu1 %v440_v37  ;;  %574 = vmatpush1.msra.mxu0 %v375_v38  ;;  %v433_v1 = vld [vmem:[%s3049_s3 + $0x830] sm:$0xff]  ;;  %v1624_v4 = vld [vmem:[%s3046_s0 + $0x48] sm:$0xff]  ;;  %v83_v8 = vmul.f32 %v1614_v2, %v1614_v2  ;;  %v84_v9 = vmul.f32 %v1619_v3, %v1619_v3  ;;  %v1643_v10 = vld [vmem:[%s3047_s1] sm:$0xff] }
  0x16   :  { %651 = vmatpush1.msra.mxu1 %v439_v39  ;;  %575 = vmatprep.subr.mxu0 %v374_v40  ;;  %v368_v6 = vld [vmem:[%s3049_s3 + $0x628] sm:$0xff]  ;;  %v1634_v7 = vld [vmem:[%s3046_s0 + $0x50] sm:$0xff]  ;;  %v90_v12 = vadd.f32 %v89_v63, %v79_v57  ;;  %v1650_v13 = vld [vmem:[%s3046_s0 + $0x58] sm:$0xff]  ;;  %v85_v14 = vmul.f32 %v1624_v4, %v1624_v4  ;;  %v118_v21 = vmul.f32 %v1643_v10, %v1643_v10 }
  0x17   :  { %652 = vmatprep.subr.mxu1 %v438_v41  ;;  %576 = vmatpush1.msra.mxu0 %v373_v45  ;;  %v1657_v15 = vld [vmem:[%s3047_s1 + $0x8] sm:$0xff]  ;;  %v1662_v16 = vld [vmem:[%s3047_s1 + $0x10] sm:$0xff]  ;;  %v367_v18 = vld [vmem:[%s3049_s3 + $0x620] sm:$0xff]  ;;  %v95_v19 = vadd.f32 %v83_v8, %v82_v5  ;;  %v86_v28 = vmul.f32 %v1634_v7, %v1634_v7  ;;  %v87_v29 = vmul.f32 %v1650_v13, %v1650_v13 }
  0x18   :  { %653 = vmatpush1.msra.mxu1 %v437_v46  ;;  %577 = vmatprep.subr.mxu0 %v372_v51  ;;  %v432_v17 = vld [vmem:[%s3049_s3 + $0x828] sm:$0xff]  ;;  %v1673_v20 = vld [vmem:[%s3047_s1 + $0x18] sm:$0xff]  ;;  %v119_v22 = vmul.f32 %v1657_v15, %v1657_v15  ;;  %v91_v23 = vadd.f32 %v90_v12, %v80_v62  ;;  %v431_v24 = vld [vmem:[%s3049_s3 + $0x820] sm:$0xff]  ;;  %v120_v27 = vmul.f32 %v1662_v16, %v1662_v16 }
  0x19   :  { %654 = vmatprep.subr.mxu1 %v436_v52  ;;  %578 = vmatpush1.msra.mxu0 %v371_v54  ;;  %v1685_v25 = vld [vmem:[%s3047_s1 + $0x20] sm:$0xff]  ;;  %v1690_v26 = vld [vmem:[%s3047_s1 + $0x28] sm:$0xff]  ;;  %v96_v30 = vadd.f32 %v95_v19, %v84_v9  ;;  %v366_v31 = vld [vmem:[%s3049_s3 + $0x618] sm:$0xff]  ;;  %v121_v35 = vmul.f32 %v1673_v20, %v1673_v20 }
  0x1a   :  { %655 = vmatpush1.msra.mxu1 %v435_v55  ;;  %579 = vmatprep.subr.mxu0 %v370_v59  ;;  %v430_v32 = vld [vmem:[%s3049_s3 + $0x818] sm:$0xff]  ;;  %v365_v33 = vld [vmem:[%s3049_s3 + $0x610] sm:$0xff]  ;;  %v92_v34 = vadd.f32 %v91_v23, %v81_v11  ;;  %v130_v36 = vadd.f32 %v119_v22, %v118_v21  ;;  %v364_v41 = vld [vmem:[%s3049_s3 + $0x608] sm:$0xff]  ;;  %v122_v50 = vmul.f32 %v1685_v25, %v1685_v25 }
  0x1b   :  { %656 = vmatprep.subr.mxu1 %v434_v60  ;;  %580 = vmatpush1.msra.mxu0 %v369_v0  ;;  %v429_v37 = vld [vmem:[%s3049_s3 + $0x810] sm:$0xff]  ;;  %v1720_v39 = vld [vmem:[%s3047_s1 + $0x38] sm:$0xff]  ;;  %v97_v40 = vadd.f32 %v96_v30, %v85_v14  ;;  %v1728_v45 = vld [vmem:[%s3047_s1 + $0x40] sm:$0xff]  ;;  %v123_v58 = vmul.f32 %v1690_v26, %v1690_v26 }
  0x1c   :  { %657 = vmatpush1.msra.mxu1 %v433_v1  ;;  %581 = vmatprep.subr.mxu0 %v368_v6  ;;  %v1715_v38 = vld [vmem:[%s3047_s1 + $0x30] sm:$0xff]  ;;  %v1733_v46 = vld [vmem:[%s3047_s1 + $0x48] sm:$0xff]  ;;  %v125_v49 = vmul.f32 %v1720_v39, %v1720_v39  ;;  %v131_v51 = vadd.f32 %v130_v36, %v120_v27  ;;  %v363_v54 = vld [vmem:[%s3049_s3 + $0x600] sm:$0xff]  ;;  %v126_v55 = vmul.f32 %v1728_v45, %v1728_v45 }
  0x1d   :  { %658 = vmatprep.subr.mxu1 %v432_v17  ;;  %582 = vmatpush1.msra.mxu0 %v367_v18  ;;  %v124_v48 = vmul.f32 %v1715_v38, %v1715_v38  ;;  %v428_v52 = vld [vmem:[%s3049_s3 + $0x808] sm:$0xff]  ;;  %v98_v57 = vadd.f32 %v97_v40, %v86_v28  ;;  %v427_v59 = vld [vmem:[%s3049_s3 + $0x800] sm:$0xff]  ;;  %v1757_v60 = vld [vmem:[%s3047_s1 + $0x50] sm:$0xff]  ;;  %v127_v0 = vmul.f32 %v1733_v46, %v1733_v46 }
  0x1e   :  { %659 = vmatpush1.msra.mxu1 %v431_v24  ;;  %93 = vadd.xlane.f32.xlu0 %v92_v34  ;;  %v426_v62 = vld [vmem:[%s3049_s3 + $0x7f8] sm:$0xff]  ;;  %v132_v63 = vadd.f32 %v131_v51, %v121_v35  ;;  %v425_v9 = vld [vmem:[%s3049_s3 + $0x7f0] sm:$0xff]  ;;  %v128_v14 = vmul.f32 %v1757_v60, %v1757_v60  ;;  %v424_v18 = vld [vmem:[%s3049_s3 + $0x7e8] sm:$0xff] }
  0x1f   :  { %583 = vmatprep.subr.mxu0 %v366_v31  ;;  %660 = vmatprep.subr.mxu1 %v430_v32  ;;  %v137_v1 = vadd.f32 %v125_v49, %v124_v48  ;;  %v490_v5 = vld [vmem:[%s3049_s3 + $0x9f8] sm:$0xff]  ;;  %v99_v6 = vadd.f32 %v98_v57, %v87_v29  ;;  %v489_v11 = vld [vmem:[%s3049_s3 + $0x9f0] sm:$0xff]  ;;  %v488_v19 = vld [vmem:[%s3049_s3 + $0x9e8] sm:$0xff] }
  0x20   :  { %584 = vmatpush1.msra.mxu0 %v365_v33  ;;  %661 = vmatpush1.msra.mxu1 %v429_v37  ;;  %v1770_v8 = vld [vmem:[%s3047_s1 + $0x58] sm:$0xff]  ;;  %v133_v12 = vadd.f32 %v132_v63, %v122_v50  ;;  %v423_v21 = vld [vmem:[%s3049_s3 + $0x7e0] sm:$0xff]  ;;  %v421_v30 = vld [vmem:[%s3049_s3 + $0x7d0] sm:$0xff] }
  0x21   :  { %585 = vmatprep.subr.mxu0 %v364_v41  ;;  %662 = vmatprep.subr.mxu1 %v428_v52  ;;  %v138_v17 = vadd.f32 %v137_v1, %v126_v55  ;;  %v129_v23 = vmul.f32 %v1770_v8, %v1770_v8  ;;  %v487_v27 = vld [vmem:[%s3049_s3 + $0x9e0] sm:$0xff]  ;;  %v422_v28 = vld [vmem:[%s3049_s3 + $0x7d8] sm:$0xff]  ;;  %v485_v32 = vld [vmem:[%s3049_s3 + $0x9d0] sm:$0xff] }
  0x22   :  { %586 = vmatpush1.msra.mxu0 %v363_v54  ;;  %663 = vmatpush1.msra.mxu1 %v427_v59  ;;  %v134_v22 = vadd.f32 %v133_v12, %v123_v58  ;;  %v486_v29 = vld [vmem:[%s3049_s3 + $0x9d8] sm:$0xff]  ;;  %v420_v33 = vld [vmem:[%s3049_s3 + $0x7c8] sm:$0xff]  ;;  %v419_v36 = vld [vmem:[%s3049_s3 + $0x7c0] sm:$0xff]  ;;  %v50_v58 = vmul.f32 %v1643_v10, %v1539_v42  ;;  %v51_v59 = vmul.f32 %v1657_v15, %v1544_v43 }
  0x23   :  { %587 = vmatprep.subr.mxu0 %v426_v62  ;;  %100 = vadd.xlane.f32.xlu1 %v99_v6  ;;  %v139_v24 = vadd.f32 %v138_v17, %v127_v0  ;;  %v484_v34 = vld [vmem:[%s3049_s3 + $0x9c8] sm:$0xff]  ;;  %v483_v37 = vld [vmem:[%s3049_s3 + $0x9c0] sm:$0xff]  ;;  %v418_v40 = vld [vmem:[%s3049_s3 + $0x7b8] sm:$0xff]  ;;  %v56_v12 = vmul.f32 %v1715_v38, %v1601_v61 }
  0x24   :  { %664 = vmatprep.subr.mxu1 %v490_v5  ;;  %588 = vmatpush2.msra.mxu0 %v425_v9  ;;  %v482_v41 = vld [vmem:[%s3049_s3 + $0x9b8] sm:$0xff]  ;;  %v417_v48 = vld [vmem:[%s3049_s3 + $0x7b0] sm:$0xff]  ;;  %v416_v50 = vld [vmem:[%s3049_s3 + $0x7a8] sm:$0xff]  ;;  %v52_v5 = vmul.f32 %v1662_v16, %v1549_v44 }
  0x25   :  { %665 = vmatpush2.msra.mxu1 %v489_v11  ;;  %589 = vmatprep.subr.mxu0 %v424_v18  ;;  %v140_v31 = vadd.f32 %v139_v24, %v128_v14  ;;  %v481_v49 = vld [vmem:[%s3049_s3 + $0x9b0] sm:$0xff]  ;;  %v480_v51 = vld [vmem:[%s3049_s3 + $0x9a8] sm:$0xff]  ;;  %v415_v52 = vld [vmem:[%s3049_s3 + $0x7a0] sm:$0xff]  ;;  %v62_v11 = vadd.f32 %v51_v59, %v50_v58  ;;  %v57_v14 = vmul.f32 %v1720_v39, %v1614_v2 }
  0x26   :  { %666 = vmatprep.subr.mxu1 %v488_v19  ;;  %135 = vadd.xlane.f32.xlu0 %v134_v22  ;;  %v479_v54 = vld [vmem:[%s3049_s3 + $0x9a0] sm:$0xff]  ;;  %v414_v55 = vld [vmem:[%s3049_s3 + $0x798] sm:$0xff]  ;;  %v413_v62 = vld [vmem:[%s3049_s3 + $0x790] sm:$0xff] }
  0x27   :  { %590 = vmatpush2.msra.mxu0 %v423_v21  ;;  %667 = vmatpush2.msra.mxu1 %v487_v27  ;;  %v141_v35 = vadd.f32 %v140_v31, %v129_v23  ;;  %v478_v57 = vld [vmem:[%s3049_s3 + $0x998] sm:$0xff]  ;;  %v477_v63 = vld [vmem:[%s3049_s3 + $0x990] sm:$0xff]  ;;  %v412_v0 = vld [vmem:[%s3049_s3 + $0x788] sm:$0xff]  ;;  %v53_v21 = vmul.f32 %v1673_v20, %v1560_v47  ;;  %v63_v24 = vadd.f32 %v62_v11, %v52_v5 }
  0x28   :  { %591 = vmatprep.subr.mxu0 %v422_v28  ;;  %668 = vmatprep.subr.mxu1 %v486_v29  ;;  %v476_v42 = vld [vmem:[%s3049_s3 + $0x988] sm:$0xff]  ;;  %v411_v43 = vld [vmem:[%s3049_s3 + $0x780] sm:$0xff]  ;;  %v410_v6 = vld [vmem:[%s3049_s3 + $0x778] sm:$0xff]  ;;  %v58_v27 = vmul.f32 %v1728_v45, %v1619_v3  ;;  %v69_v28 = vadd.f32 %v57_v14, %v56_v12 }
  0x29   :  { %592 = vmatpush2.msra.mxu0 %v421_v30  ;;  %669 = vmatpush2.msra.mxu1 %v485_v32  ;;  %v475_v1 = vld [vmem:[%s3049_s3 + $0x980] sm:$0xff]  ;;  %v474_v9 = vld [vmem:[%s3049_s3 + $0x978] sm:$0xff]  ;;  %v409_v44 = vld [vmem:[%s3049_s3 + $0x770] sm:$0xff] }
  0x2a   :  { %593 = vmatprep.subr.mxu0 %v420_v33  ;;  %142 = vadd.xlane.f32.xlu1 %v141_v35  ;;  %v473_v17 = vld [vmem:[%s3049_s3 + $0x970] sm:$0xff]  ;;  %v408_v18 = vld [vmem:[%s3049_s3 + $0x768] sm:$0xff]  ;;  %v407_v2 = vld [vmem:[%s3049_s3 + $0x760] sm:$0xff]  ;;  %v54_v33 = vmul.f32 %v1685_v25, %v1577_v53 }
  0x2b   :  { %670 = vmatprep.subr.mxu1 %v484_v34  ;;  %594 = vmatpush2.msra.mxu0 %v419_v36  ;;  %v472_v61 = vld [vmem:[%s3049_s3 + $0x968] sm:$0xff]  ;;  %v471_v19 = vld [vmem:[%s3049_s3 + $0x960] sm:$0xff]  ;;  %v406_v22 = vld [vmem:[%s3049_s3 + $0x758] sm:$0xff]  ;;  %v64_v36 = vadd.f32 %v63_v24, %v53_v21 }
  0x2c   :  { %671 = vmatpush2.msra.mxu1 %v483_v37  ;;  %595 = vmatprep.subr.mxu0 %v418_v40  ;;  %v470_v23 = vld [vmem:[%s3049_s3 + $0x958] sm:$0xff]  ;;  %v405_v47 = vld [vmem:[%s3049_s3 + $0x750] sm:$0xff]  ;;  %v404_v30 = vld [vmem:[%s3049_s3 + $0x748] sm:$0xff]  ;;  %v59_v37 = vmul.f32 %v1733_v46, %v1624_v4  ;;  %v70_v40 = vadd.f32 %v69_v28, %v58_v27 }
  0x2d   :  { %672 = vmatprep.subr.mxu1 %v482_v41  ;;  %596 = vmatpush2.msra.mxu0 %v417_v48  ;;  %v469_v29 = vld [vmem:[%s3049_s3 + $0x950] sm:$0xff]  ;;  %v468_v3 = vld [vmem:[%s3049_s3 + $0x948] sm:$0xff]  ;;  %v403_v31 = vld [vmem:[%s3049_s3 + $0x740] sm:$0xff] }
  0x2e   :  { %673 = vmatpush2.msra.mxu1 %v481_v49  ;;  %597 = vmatprep.subr.mxu0 %v416_v50  ;;  %v467_v32 = vld [vmem:[%s3049_s3 + $0x940] sm:$0xff]  ;;  %v402_v34 = vld [vmem:[%s3049_s3 + $0x738] sm:$0xff]  ;;  %v401_v53 = vld [vmem:[%s3049_s3 + $0x730] sm:$0xff]  ;;  %v71_v58 = vadd.f32 %v70_v40, %v59_v37 }
  0x2f   :  { %674 = vmatprep.subr.mxu1 %v480_v51  ;;  %598 = vmatpush2.msra.mxu0 %v415_v52  ;;  %v466_v35 = vld [vmem:[%s3049_s3 + $0x938] sm:$0xff]  ;;  %v465_v41 = vld [vmem:[%s3049_s3 + $0x930] sm:$0xff]  ;;  %v400_v48 = vld [vmem:[%s3049_s3 + $0x728] sm:$0xff]  ;;  %v55_v51 = vmul.f32 %v1690_v26, %v1588_v56 }
  0x30   :  { %675 = vmatpush2.msra.mxu1 %v479_v54  ;;  %599 = vmatprep.subr.mxu0 %v414_v55  ;;  %v464_v4 = vld [vmem:[%s3049_s3 + $0x928] sm:$0xff]  ;;  %v399_v49 = vld [vmem:[%s3049_s3 + $0x720] sm:$0xff]  ;;  %v398_v52 = vld [vmem:[%s3049_s3 + $0x718] sm:$0xff]  ;;  %v65_v55 = vadd.f32 %v64_v36, %v54_v33 }
  0x31   :  { %676 = vmatprep.subr.mxu1 %v478_v57  ;;  %600 = vmatpush2.msra.mxu0 %v413_v62  ;;  %v463_v50 = vld [vmem:[%s3049_s3 + $0x920] sm:$0xff]  ;;  %v462_v54 = vld [vmem:[%s3049_s3 + $0x918] sm:$0xff]  ;;  %v60_v57 = vmul.f32 %v1757_v60, %v1634_v7  ;;  %v397_v56 = vld [vmem:[%s3049_s3 + $0x710] sm:$0xff] }
  0x32   :  { %677 = vmatpush2.msra.mxu1 %v477_v63  ;;  %601 = vmatprep.subr.mxu0 %v412_v0  ;;  %v461_v59 = vld [vmem:[%s3049_s3 + $0x910] sm:$0xff]  ;;  %v396_v62 = vld [vmem:[%s3049_s3 + $0x708] sm:$0xff]  ;;  %v395_v63 = vld [vmem:[%s3049_s3 + $0x700] sm:$0xff] }
  0x33   :  { %678 = vmatprep.subr.mxu1 %v476_v42  ;;  %602 = vmatpush2.msra.mxu0 %v411_v43  ;;  %v460_v7 = vld [vmem:[%s3049_s3 + $0x908] sm:$0xff]  ;;  %v459_v0 = vld [vmem:[%s3049_s3 + $0x900] sm:$0xff]  ;;  %v66_v42 = vadd.f32 %v65_v55, %v55_v51  ;;  %v61_v43 = vmul.f32 %v1770_v8, %v1650_v13  ;;  %v522_v5 = vld [vmem:[%s3049_s3 + $0xaf8] sm:$0xff] }
  0x34   :  { %679 = vmatpush2.msra.mxu1 %v475_v1  ;;  %603 = vmatprep.subr.mxu0 %v410_v6  ;;  %v72_v1 = vadd.f32 %v71_v58, %v60_v57  ;;  %v521_v6 = vld [vmem:[%s3049_s3 + $0xaf0] sm:$0xff]  ;;  %v202_v13 = vld [vmem:[%s3049_s3 + $0xf8] sm:$0xff]  ;;  %v519_v11 = vld [vmem:[%s3049_s3 + $0xae0] sm:$0xff] }
  0x35   :  { %680 = vmatprep.subr.mxu1 %v474_v9  ;;  %604 = vmatpush2.msra.mxu0 %v409_v44  ;;  %v201_v9 = vld [vmem:[%s3049_s3 + $0xf0] sm:$0xff]  ;;  %v200_v12 = vld [vmem:[%s3049_s3 + $0xe8] sm:$0xff]  ;;  %v199_v14 = vld [vmem:[%s3049_s3 + $0xe0] sm:$0xff] }
  0x36   :  { %681 = vmatpush2.msra.mxu1 %v473_v17  ;;  %605 = vmatprep.subr.mxu0 %v408_v18  ;;  %v516_v44 = vld [vmem:[%s3049_s3 + $0xac8] sm:$0xff]  ;;  %v198_v17 = vld [vmem:[%s3049_s3 + $0xd8] sm:$0xff]  ;;  %v515_v18 = vld [vmem:[%s3049_s3 + $0xac0] sm:$0xff] }
  0x37   :  { %682 = vmatprep.subr.mxu1 %v472_v61  ;;  %606 = vmatpush2.msra.mxu0 %v407_v2  ;;  %v197_v61 = vld [vmem:[%s3049_s3 + $0xd0] sm:$0xff]  ;;  %v514_v2 = vld [vmem:[%s3049_s3 + $0xab8] sm:$0xff]  ;;  %v511_v27 = vld [vmem:[%s3049_s3 + $0xaa0] sm:$0xff] }
  0x38   :  { %683 = vmatpush2.msra.mxu1 %v471_v19  ;;  %607 = vmatprep.subr.mxu0 %v406_v22  ;;  %v196_v19 = vld [vmem:[%s3049_s3 + $0xc8] sm:$0xff]  ;;  %v513_v21 = vld [vmem:[%s3049_s3 + $0xab0] sm:$0xff]  ;;  %v195_v22 = vld [vmem:[%s3049_s3 + $0xc0] sm:$0xff] }
  0x39   :  { %684 = vmatprep.subr.mxu1 %v470_v23  ;;  %608 = vmatpush2.msra.mxu0 %v405_v47  ;;  %v512_v23 = vld [vmem:[%s3049_s3 + $0xaa8] sm:$0xff]  ;;  %v194_v24 = vld [vmem:[%s3049_s3 + $0xb8] sm:$0xff]  ;;  %v193_v28 = vld [vmem:[%s3049_s3 + $0xb0] sm:$0xff] }
  0x3a   :  { %685 = vmatpush2.msra.mxu1 %v469_v29  ;;  %609 = vmatprep.subr.mxu0 %v404_v30  ;;  %v510_v47 = vld [vmem:[%s3049_s3 + $0xa98] sm:$0xff]  ;;  %v192_v29 = vld [vmem:[%s3049_s3 + $0xa8] sm:$0xff]  ;;  %v509_v30 = vld [vmem:[%s3049_s3 + $0xa90] sm:$0xff] }
  0x3b   :  { %686 = vmatprep.subr.mxu1 %v468_v3  ;;  %610 = vmatpush2.msra.mxu0 %v403_v31  ;;  %v191_v3 = vld [vmem:[%s3049_s3 + $0xa0] sm:$0xff]  ;;  %v508_v31 = vld [vmem:[%s3049_s3 + $0xa88] sm:$0xff]  ;;  %v505_v37 = vld [vmem:[%s3049_s3 + $0xa70] sm:$0xff] }
  0x3c   :  { %687 = vmatpush2.msra.mxu1 %v467_v32  ;;  %611 = vmatprep.subr.mxu0 %v402_v34  ;;  %v190_v32 = vld [vmem:[%s3049_s3 + $0x98] sm:$0xff]  ;;  %v507_v33 = vld [vmem:[%s3049_s3 + $0xa80] sm:$0xff]  ;;  %v189_v34 = vld [vmem:[%s3049_s3 + $0x90] sm:$0xff] }
  0x3d   :  { %688 = vmatprep.subr.mxu1 %v466_v35  ;;  %612 = vmatpush2.msra.mxu0 %v401_v53  ;;  %v506_v35 = vld [vmem:[%s3049_s3 + $0xa78] sm:$0xff]  ;;  %v188_v36 = vld [vmem:[%s3049_s3 + $0x88] sm:$0xff]  ;;  %v187_v40 = vld [vmem:[%s3049_s3 + $0x80] sm:$0xff] }
  0x3e   :  { %689 = vmatpush2.msra.mxu1 %v465_v41  ;;  %613 = vmatprep.subr.mxu0 %v400_v48  ;;  %v504_v53 = vld [vmem:[%s3049_s3 + $0xa68] sm:$0xff]  ;;  %v186_v41 = vld [vmem:[%s3049_s3 + $0x78] sm:$0xff]  ;;  %v503_v48 = vld [vmem:[%s3049_s3 + $0xa60] sm:$0xff] }
  0x3f   :  { %690 = vmatprep.subr.mxu1 %v464_v4  ;;  %614 = vmatpush2.msra.mxu0 %v399_v49  ;;  %v185_v4 = vld [vmem:[%s3049_s3 + $0x70] sm:$0xff]  ;;  %v502_v49 = vld [vmem:[%s3049_s3 + $0xa58] sm:$0xff]  ;;  %v499_v57 = vld [vmem:[%s3049_s3 + $0xa40] sm:$0xff] }
  0x40   :  { %691 = vmatpush2.msra.mxu1 %v463_v50  ;;  %615 = vmatprep.subr.mxu0 %v398_v52  ;;  %v184_v50 = vld [vmem:[%s3049_s3 + $0x68] sm:$0xff]  ;;  %v501_v51 = vld [vmem:[%s3049_s3 + $0xa50] sm:$0xff]  ;;  %v183_v52 = vld [vmem:[%s3049_s3 + $0x60] sm:$0xff] }
  0x41   :  { %692 = vmatprep.subr.mxu1 %v462_v54  ;;  %616 = vmatpush2.msra.mxu0 %v397_v56  ;;  %v500_v54 = vld [vmem:[%s3049_s3 + $0xa48] sm:$0xff]  ;;  %v182_v55 = vld [vmem:[%s3049_s3 + $0x58] sm:$0xff]  ;;  %v181_v58 = vld [vmem:[%s3049_s3 + $0x50] sm:$0xff] }
  0x42   :  { %693 = vmatpush2.msra.mxu1 %v461_v59  ;;  %617 = vmatprep.subr.mxu0 %v396_v62  ;;  %v498_v56 = vld [vmem:[%s3049_s3 + $0xa38] sm:$0xff]  ;;  %v180_v59 = vld [vmem:[%s3049_s3 + $0x48] sm:$0xff]  ;;  %v497_v62 = vld [vmem:[%s3049_s3 + $0xa30] sm:$0xff] }
  0x43   :  { %694 = vmatprep.subr.mxu1 %v460_v7  ;;  %618 = vmatpush2.msra.mxu0 %v395_v63  ;;  %v179_v7 = vld [vmem:[%s3049_s3 + $0x40] sm:$0xff]  ;;  %v496_v63 = vld [vmem:[%s3049_s3 + $0xa28] sm:$0xff] }
  0x44   :  { %619 = vmatprep.mubr.f32.mxu0 %v1657_v15  ;;  %695 = vmatpush2.msra.mxu1 %v459_v0  ;;  %v520_v15 = vld [vmem:[%s3049_s3 + $0xae8] sm:$0xff]  ;;  %v178_v0 = vld [vmem:[%s3049_s3 + $0x38] sm:$0xff] }
  0x45   :  { %696 = vmatprep.mubr.f32.mxu1 %v1673_v20  ;;  %67 = vadd.xlane.f32.xlu0 %v66_v42  ;;  %v73_v20 = vadd.f32 %v72_v1, %v61_v43  ;;  %v495_v42 = vld [vmem:[%s3049_s3 + $0xa20] sm:$0xff]  ;;  %v177_v43 = vld [vmem:[%s3049_s3 + $0x30] sm:$0xff]  ;;  %v494_v1 = vld [vmem:[%s3049_s3 + $0xa18] sm:$0xff] }
  0x46   :  { %620 = vmatmul.mubr.f32.vlgmr.msra.gmra.mxu0 %v1643_v10  ;;  %697 = vmatmul.mubr.f32.vlgmr.msra.gmra.mxu1 %v1662_v16  ;;  %v518_v10 = vld [vmem:[%s3049_s3 + $0xad8] sm:$0xff]  ;;  %v517_v16 = vld [vmem:[%s3049_s3 + $0xad0] sm:$0xff] }
  0x47   :  { %709 = vmatprep.subr.mxu0 %v522_v5  ;;  %786 = vmatprep.subr.mxu1 %v202_v13  ;;  %v176_v5 = vld [vmem:[%s3049_s3 + $0x28] sm:$0xff]  ;;  %v175_v13 = vld [vmem:[%s3049_s3 + $0x20] sm:$0xff] }
  0x48   :  { %710 = vmatpush1.msra.mxu0 %v521_v6  ;;  %787 = vmatpush1.msra.mxu1 %v201_v9  ;;  %v493_v6 = vld [vmem:[%s3049_s3 + $0xa10] sm:$0xff]  ;;  %v174_v9 = vld [vmem:[%s3049_s3 + $0x18] sm:$0xff] }
  0x49   :  { %711 = vmatprep.subr.mxu0 %v520_v15  ;;  %74 = vadd.xlane.f32.xlu1 %v73_v20  ;;  %v492_v15 = vld [vmem:[%s3049_s3 + $0xa08] sm:$0xff]  ;;  %v491_v20 = vld [vmem:[%s3049_s3 + $0xa00] sm:$0xff] }
  0x4a   :  { %712 = vmatpush1.msra.mxu0 %v519_v11  ;;  %788 = vmatprep.subr.mxu1 %v200_v12  ;;  %v173_v11 = vld [vmem:[%s3049_s3 + $0x10] sm:$0xff]  ;;  %v172_v12 = vld [vmem:[%s3049_s3 + $0x8] sm:$0xff] }
  0x4b   :  { %713 = vmatprep.subr.mxu0 %v518_v10  ;;  %789 = vmatpush1.msra.mxu1 %v199_v14  ;;  %v554_v10 = vld [vmem:[%s3049_s3 + $0xbf8] sm:$0xff]  ;;  %v171_v14 = vld [vmem:[%s3049_s3] sm:$0xff] }
  0x4c   :  { %714 = vmatpush1.msra.mxu0 %v517_v16  ;;  %790 = vmatprep.subr.mxu1 %v198_v17  ;;  %v553_v16 = vld [vmem:[%s3049_s3 + $0xbf0] sm:$0xff]  ;;  %v234_v17 = vld [vmem:[%s3049_s3 + $0x1f8] sm:$0xff] }
  0x4d   :  { %715 = vmatprep.subr.mxu0 %v516_v44  ;;  %791 = vmatpush1.msra.mxu1 %v197_v61  ;;  %v552_v44 = vld [vmem:[%s3049_s3 + $0xbe8] sm:$0xff]  ;;  %v233_v61 = vld [vmem:[%s3049_s3 + $0x1f0] sm:$0xff] }
  0x4e   :  { %716 = vmatpush1.msra.mxu0 %v515_v18  ;;  %792 = vmatprep.subr.mxu1 %v196_v19  ;;  %v551_v18 = vld [vmem:[%s3049_s3 + $0xbe0] sm:$0xff]  ;;  %v232_v19 = vld [vmem:[%s3049_s3 + $0x1e8] sm:$0xff] }
  0x4f   :  { %717 = vmatprep.subr.mxu0 %v514_v2  ;;  %793 = vmatpush1.msra.mxu1 %v195_v22  ;;  %v550_v2 = vld [vmem:[%s3049_s3 + $0xbd8] sm:$0xff]  ;;  %v231_v22 = vld [vmem:[%s3049_s3 + $0x1e0] sm:$0xff] }
  0x50   :  { %718 = vmatpush1.msra.mxu0 %v513_v21  ;;  %794 = vmatprep.subr.mxu1 %v194_v24  ;;  %v549_v21 = vld [vmem:[%s3049_s3 + $0xbd0] sm:$0xff]  ;;  %v230_v24 = vld [vmem:[%s3049_s3 + $0x1d8] sm:$0xff] }
  0x51   :  { %719 = vmatprep.subr.mxu0 %v512_v23  ;;  %795 = vmatpush1.msra.mxu1 %v193_v28  ;;  %v548_v23 = vld [vmem:[%s3049_s3 + $0xbc8] sm:$0xff]  ;;  %v229_v28 = vld [vmem:[%s3049_s3 + $0x1d0] sm:$0xff] }
  0x52   :  { %720 = vmatpush1.msra.mxu0 %v511_v27  ;;  %796 = vmatprep.subr.mxu1 %v192_v29  ;;  %v547_v27 = vld [vmem:[%s3049_s3 + $0xbc0] sm:$0xff]  ;;  %v228_v29 = vld [vmem:[%s3049_s3 + $0x1c8] sm:$0xff] }
  0x53   :  { %721 = vmatprep.subr.mxu0 %v510_v47  ;;  %797 = vmatpush1.msra.mxu1 %v191_v3  ;;  %v546_v47 = vld [vmem:[%s3049_s3 + $0xbb8] sm:$0xff]  ;;  %v227_v3 = vld [vmem:[%s3049_s3 + $0x1c0] sm:$0xff] }
  0x54   :  { %722 = vmatpush1.msra.mxu0 %v509_v30  ;;  %798 = vmatprep.subr.mxu1 %v190_v32  ;;  %v545_v30 = vld [vmem:[%s3049_s3 + $0xbb0] sm:$0xff]  ;;  %v226_v32 = vld [vmem:[%s3049_s3 + $0x1b8] sm:$0xff] }
  0x55   :  { %723 = vmatprep.subr.mxu0 %v508_v31  ;;  %799 = vmatpush1.msra.mxu1 %v189_v34  ;;  %v544_v31 = vld [vmem:[%s3049_s3 + $0xba8] sm:$0xff]  ;;  %v225_v34 = vld [vmem:[%s3049_s3 + $0x1b0] sm:$0xff] }
  0x56   :  { %724 = vmatpush1.msra.mxu0 %v507_v33  ;;  %800 = vmatprep.subr.mxu1 %v188_v36  ;;  %v543_v33 = vld [vmem:[%s3049_s3 + $0xba0] sm:$0xff]  ;;  %v224_v36 = vld [vmem:[%s3049_s3 + $0x1a8] sm:$0xff] }
  0x57   :  { %725 = vmatprep.subr.mxu0 %v506_v35  ;;  %801 = vmatpush1.msra.mxu1 %v187_v40  ;;  %v542_v35 = vld [vmem:[%s3049_s3 + $0xb98] sm:$0xff]  ;;  %v223_v40 = vld [vmem:[%s3049_s3 + $0x1a0] sm:$0xff] }
  0x58   :  { %726 = vmatpush1.msra.mxu0 %v505_v37  ;;  %802 = vmatprep.subr.mxu1 %v186_v41  ;;  %v541_v37 = vld [vmem:[%s3049_s3 + $0xb90] sm:$0xff]  ;;  %v222_v41 = vld [vmem:[%s3049_s3 + $0x198] sm:$0xff] }
  0x59   :  { %727 = vmatprep.subr.mxu0 %v504_v53  ;;  %803 = vmatpush1.msra.mxu1 %v185_v4  ;;  %v540_v53 = vld [vmem:[%s3049_s3 + $0xb88] sm:$0xff]  ;;  %v221_v4 = vld [vmem:[%s3049_s3 + $0x190] sm:$0xff] }
  0x5a   :  { %728 = vmatpush1.msra.mxu0 %v503_v48  ;;  %804 = vmatprep.subr.mxu1 %v184_v50  ;;  %v539_v48 = vld [vmem:[%s3049_s3 + $0xb80] sm:$0xff]  ;;  %v220_v50 = vld [vmem:[%s3049_s3 + $0x188] sm:$0xff] }
  0x5b   :  { %729 = vmatprep.subr.mxu0 %v502_v49  ;;  %805 = vmatpush1.msra.mxu1 %v183_v52  ;;  %v538_v49 = vld [vmem:[%s3049_s3 + $0xb78] sm:$0xff]  ;;  %v219_v52 = vld [vmem:[%s3049_s3 + $0x180] sm:$0xff] }
  0x5c   :  { %730 = vmatpush1.msra.mxu0 %v501_v51  ;;  %806 = vmatprep.subr.mxu1 %v182_v55  ;;  %v537_v51 = vld [vmem:[%s3049_s3 + $0xb70] sm:$0xff]  ;;  %v218_v55 = vld [vmem:[%s3049_s3 + $0x178] sm:$0xff] }
  0x5d   :  { %731 = vmatprep.subr.mxu0 %v500_v54  ;;  %807 = vmatpush1.msra.mxu1 %v181_v58  ;;  %v536_v54 = vld [vmem:[%s3049_s3 + $0xb68] sm:$0xff]  ;;  %v217_v58 = vld [vmem:[%s3049_s3 + $0x170] sm:$0xff] }
  0x5e   :  { %732 = vmatpush1.msra.mxu0 %v499_v57  ;;  %808 = vmatprep.subr.mxu1 %v180_v59  ;;  %v535_v57 = vld [vmem:[%s3049_s3 + $0xb60] sm:$0xff]  ;;  %v216_v59 = vld [vmem:[%s3049_s3 + $0x168] sm:$0xff] }
  0x5f   :  { %733 = vmatprep.subr.mxu0 %v498_v56  ;;  %809 = vmatpush1.msra.mxu1 %v179_v7  ;;  %v534_v56 = vld [vmem:[%s3049_s3 + $0xb58] sm:$0xff]  ;;  %v215_v7 = vld [vmem:[%s3049_s3 + $0x160] sm:$0xff] }
  0x60   :  { %734 = vmatpush1.msra.mxu0 %v497_v62  ;;  %810 = vmatprep.subr.mxu1 %v178_v0  ;;  %v533_v62 = vld [vmem:[%s3049_s3 + $0xb50] sm:$0xff]  ;;  %v214_v0 = vld [vmem:[%s3049_s3 + $0x158] sm:$0xff] }
  0x61   :  { %735 = vmatprep.subr.mxu0 %v496_v63  ;;  %811 = vmatpush1.msra.mxu1 %v177_v43  ;;  %v532_v63 = vld [vmem:[%s3049_s3 + $0xb48] sm:$0xff]  ;;  %v213_v43 = vld [vmem:[%s3049_s3 + $0x150] sm:$0xff] }
  0x62   :  { %736 = vmatpush1.msra.mxu0 %v495_v42  ;;  %812 = vmatprep.subr.mxu1 %v176_v5  ;;  %v531_v42 = vld [vmem:[%s3049_s3 + $0xb40] sm:$0xff]  ;;  %v212_v5 = vld [vmem:[%s3049_s3 + $0x148] sm:$0xff] }
  0x63   :  { %737 = vmatprep.subr.mxu0 %v494_v1  ;;  %813 = vmatpush1.msra.mxu1 %v175_v13  ;;  %v530_v1 = vld [vmem:[%s3049_s3 + $0xb38] sm:$0xff]  ;;  %v211_v13 = vld [vmem:[%s3049_s3 + $0x140] sm:$0xff] }
  0x64   :  { %738 = vmatpush1.msra.mxu0 %v493_v6  ;;  %814 = vmatprep.subr.mxu1 %v174_v9  ;;  %v529_v6 = vld [vmem:[%s3049_s3 + $0xb30] sm:$0xff]  ;;  %v210_v9 = vld [vmem:[%s3049_s3 + $0x138] sm:$0xff] }
  0x65   :  { %739 = vmatprep.subr.mxu0 %v492_v15  ;;  %815 = vmatpush1.msra.mxu1 %v173_v11  ;;  %v528_v15 = vld [vmem:[%s3049_s3 + $0xb28] sm:$0xff]  ;;  %v209_v11 = vld [vmem:[%s3049_s3 + $0x130] sm:$0xff] }
  0x66   :  { %740 = vmatpush1.msra.mxu0 %v491_v20  ;;  %816 = vmatprep.subr.mxu1 %v172_v12  ;;  %v527_v20 = vld [vmem:[%s3049_s3 + $0xb20] sm:$0xff] }
  0x67   :  { %741 = vmatprep.subr.mxu0 %v554_v10  ;;  %817 = vmatpush1.msra.mxu1 %v171_v14  ;;  %v526_v10 = vld [vmem:[%s3049_s3 + $0xb18] sm:$0xff]  ;;  %v207_v12 = vld [vmem:[%s3049_s3 + $0x120] sm:$0xff]  ;;  %v205_v14 = vld [vmem:[%s3049_s3 + $0x110] sm:$0xff] }
  0x68   :  { %742 = vmatpush2.msra.mxu0 %v553_v16  ;;  %818 = vmatprep.subr.mxu1 %v234_v17  ;;  %v524_v16 = vld [vmem:[%s3049_s3 + $0xb08] sm:$0xff]  ;;  %v266_v17 = vld [vmem:[%s3049_s3 + $0x2f8] sm:$0xff] }
  0x69   :  { %743 = vmatprep.subr.mxu0 %v552_v44  ;;  %819 = vmatpush2.msra.mxu1 %v233_v61  ;;  %v204_v44 = vld [vmem:[%s3049_s3 + $0x108] sm:$0xff]  ;;  %v265_v61 = vld [vmem:[%s3049_s3 + $0x2f0] sm:$0xff] }
  0x6a   :  { %744 = vmatpush2.msra.mxu0 %v551_v18  ;;  %820 = vmatprep.subr.mxu1 %v232_v19  ;;  %v203_v18 = vld [vmem:[%s3049_s3 + $0x100] sm:$0xff]  ;;  %v1336_v19 = vld [vmem:[%s3046_s0 + $0x8] sm:$0xff] }
  0x6b   :  { %745 = vmatprep.subr.mxu0 %v550_v2  ;;  %821 = vmatpush2.msra.mxu1 %v231_v22  ;;  %v264_v2 = vld [vmem:[%s3049_s3 + $0x2e8] sm:$0xff]  ;;  %v329_v22 = vld [vmem:[%s3049_s3 + $0x4f0] sm:$0xff] }
  0x6c   :  { %746 = vmatpush2.msra.mxu0 %v549_v21  ;;  %822 = vmatprep.subr.mxu1 %v230_v24  ;;  %v1337_v21 = vld [vmem:[%s3046_s0] sm:$0xff]  ;;  %v328_v24 = vld [vmem:[%s3049_s3 + $0x4e8] sm:$0xff] }
  0x6d   :  { %747 = vmatprep.subr.mxu0 %v548_v23  ;;  %823 = vmatpush2.msra.mxu1 %v229_v28  ;;  %v262_v23 = vld [vmem:[%s3049_s3 + $0x2d8] sm:$0xff]  ;;  %v327_v28 = vld [vmem:[%s3049_s3 + $0x4e0] sm:$0xff] }
  0x6e   :  { %748 = vmatpush2.msra.mxu0 %v547_v27  ;;  %824 = vmatprep.subr.mxu1 %v228_v29  ;;  %v261_v27 = vld [vmem:[%s3049_s3 + $0x2d0] sm:$0xff]  ;;  %v1338_v29 = vld [vmem:[%s3046_s0 + $0x38] sm:$0xff] }
  0x6f   :  { %749 = vmatprep.subr.mxu0 %v546_v47  ;;  %825 = vmatpush2.msra.mxu1 %v227_v3  ;;  %v260_v47 = vld [vmem:[%s3049_s3 + $0x2c8] sm:$0xff]  ;;  %v258_v3 = vld [vmem:[%s3049_s3 + $0x2b8] sm:$0xff] }
  0x70   :  { %750 = vmatpush2.msra.mxu0 %v545_v30  ;;  %826 = vmatprep.subr.mxu1 %v226_v32  ;;  %v325_v30 = vld [vmem:[%s3049_s3 + $0x4d0] sm:$0xff] }
  0x71   :  { %751 = vmatprep.subr.mxu0 %v544_v31  ;;  %827 = vmatpush2.msra.mxu1 %v225_v34  ;;  %v324_v31 = vld [vmem:[%s3049_s3 + $0x4c8] sm:$0xff]  ;;  %v1339_v32 = vld [vmem:[%s3046_s0 + $0x30] sm:$0xff]  ;;  %v323_v34 = vld [vmem:[%s3049_s3 + $0x4c0] sm:$0xff] }
  0x72   :  { %752 = vmatpush2.msra.mxu0 %v543_v33  ;;  %828 = vmatprep.subr.mxu1 %v224_v36  ;;  %v257_v33 = vld [vmem:[%s3049_s3 + $0x2b0] sm:$0xff]  ;;  %v322_v36 = vld [vmem:[%s3049_s3 + $0x4b8] sm:$0xff] }
  0x73   :  { %753 = vmatprep.subr.mxu0 %v542_v35  ;;  %829 = vmatpush2.msra.mxu1 %v223_v40  ;;  %v256_v35 = vld [vmem:[%s3049_s3 + $0x2a8] sm:$0xff]  ;;  %v321_v40 = vld [vmem:[%s3049_s3 + $0x4b0] sm:$0xff] }
  0x74   :  { %754 = vmatpush2.msra.mxu0 %v541_v37  ;;  %830 = vmatprep.subr.mxu1 %v222_v41  ;;  %v255_v37 = vld [vmem:[%s3049_s3 + $0x2a0] sm:$0xff] }
  0x75   :  { %755 = vmatprep.subr.mxu0 %v540_v53  ;;  %831 = vmatpush2.msra.mxu1 %v221_v4 }
  0x76   :  { %756 = vmatpush2.msra.mxu0 %v539_v48  ;;  %832 = vmatprep.subr.mxu1 %v220_v50 }
  0x77   :  { %757 = vmatprep.subr.mxu0 %v538_v49  ;;  %833 = vmatpush2.msra.mxu1 %v219_v52 }
  0x78   :  { %758 = vmatpush2.msra.mxu0 %v537_v51  ;;  %834 = vmatprep.subr.mxu1 %v218_v55 }
  0x79   :  { %759 = vmatprep.subr.mxu0 %v536_v54  ;;  %835 = vmatpush2.msra.mxu1 %v217_v58 }
  0x7a   :  { %760 = vmatpush2.msra.mxu0 %v535_v57  ;;  %836 = vmatprep.subr.mxu1 %v216_v59 }
  0x7b   :  { %761 = vmatprep.subr.mxu0 %v534_v56  ;;  %837 = vmatpush2.msra.mxu1 %v215_v7 }
  0x7c   :  { %762 = vmatpush2.msra.mxu0 %v533_v62  ;;  %838 = vmatprep.subr.mxu1 %v214_v0 }
  0x7d   :  { %763 = vmatprep.subr.mxu0 %v532_v63  ;;  %839 = vmatpush2.msra.mxu1 %v213_v43 }
  0x7e   :  { %764 = vmatpush2.msra.mxu0 %v531_v42  ;;  %840 = vmatprep.subr.mxu1 %v212_v5 }
  0x7f   :  { %765 = vmatprep.subr.mxu0 %v530_v1  ;;  %841 = vmatpush2.msra.mxu1 %v211_v13 }
  0x80   :  { %766 = vmatpush2.msra.mxu0 %v529_v6  ;;  %625 = vmatprep.mubr.f32.mxu0 %v1720_v39  ;;  %v208_v39 = vld [vmem:[%s3049_s3 + $0x128] sm:$0xff] }
  0x81   :  { %702 = vmatprep.mubr.f32.mxu1 %v1733_v46  ;;  %767 = vmatprep.subr.mxu0 %v528_v15  ;;  %v525_v46 = vld [vmem:[%s3049_s3 + $0xb10] sm:$0xff] }
  0x82   :  { %842 = vmatprep.subr.mxu1 %v210_v9  ;;  %626 = vmatmul.mubr.f32.gmra.mxu0 %v1715_v38  ;;  %v206_v38 = vld [vmem:[%s3049_s3 + $0x118] sm:$0xff] }
  0x83   :  { %703 = vmatmul.mubr.f32.gmra.mxu1 %v1728_v45  ;;  %768 = vmatpush2.msra.mxu0 %v527_v20  ;;  %v523_v45 = vld [vmem:[%s3049_s3 + $0xb00] sm:$0xff] }
  0x84   :  { %843 = vmatpush2.msra.mxu1 %v209_v11  ;;  %769 = vmatprep.subr.mxu0 %v526_v10 }
  0x85   :  { %844 = vmatprep.subr.mxu1 %v208_v39  ;;  %770 = vmatpush2.msra.mxu0 %v525_v46 }
  0x86   :  { %845 = vmatpush2.msra.mxu1 %v207_v12  ;;  %771 = vmatprep.subr.mxu0 %v524_v16 }
  0x87   :  { %846 = vmatprep.subr.mxu1 %v206_v38  ;;  %772 = vmatpush2.msra.mxu0 %v523_v45 }
  0x88   :  { %773 = vmatprep.mubr.f32.mxu0 %v1690_v26  ;;  %847 = vmatpush2.msra.mxu1 %v205_v14  ;;  %v330_v26 = vld [vmem:[%s3049_s3 + $0x4f8] sm:$0xff] }
  0x89   :  { %774 = vmatmul.mubr.f32.vlgmr.msra.gmra.mxu0 %v1685_v25  ;;  %848 = vmatprep.subr.mxu1 %v204_v44  ;;  %v263_v25 = vld [vmem:[%s3049_s3 + $0x2e0] sm:$0xff] }
  0x8a   :  { %863 = vmatprep.subr.mxu0 %v266_v17  ;;  %849 = vmatpush2.msra.mxu1 %v203_v18 }
  0x8b   :  { %850 = vmatprep.mubr.f32.mxu1 %v1336_v19  ;;  %864 = vmatpush1.msra.mxu0 %v265_v61 }
  0x8c   :  { %851 = vmatmul.mubr.f32.vlgmr.msra.gmra.mxu1 %v1337_v21  ;;  %865 = vmatprep.subr.mxu0 %v264_v2 }
  0x8d   :  { %940 = vmatprep.subr.mxu1 %v330_v26  ;;  %779 = vmatprep.mubr.f32.mxu0 %v1770_v8  ;;  %v326_v8 = vld [vmem:[%s3049_s3 + $0x4d8] sm:$0xff] }
  0x8e   :  { %866 = vmatpush1.msra.mxu0 %v263_v25  ;;  %941 = vmatpush1.msra.mxu1 %v329_v22 }
  0x8f   :  { %780 = vmatmul.mubr.f32.gmra.mxu0 %v1757_v60  ;;  %867 = vmatprep.subr.mxu0 %v262_v23  ;;  %v259_v60 = vld [vmem:[%s3049_s3 + $0x2c0] sm:$0xff] }
  0x90   :  { %942 = vmatprep.subr.mxu1 %v328_v24  ;;  %856 = vmatprep.mubr.f32.mxu1 %v1338_v29 }
  0x91   :  { %868 = vmatpush1.msra.mxu0 %v261_v27  ;;  %943 = vmatpush1.msra.mxu1 %v327_v28 }
  0x92   :  { %869 = vmatprep.subr.mxu0 %v260_v47  ;;  %857 = vmatmul.mubr.f32.gmra.mxu1 %v1339_v32 }
  0x93   :  { %944 = vmatprep.subr.mxu1 %v326_v8  ;;  %870 = vmatpush1.msra.mxu0 %v259_v60 }
  0x94   :  { %945 = vmatpush1.msra.mxu1 %v325_v30  ;;  %871 = vmatprep.subr.mxu0 %v258_v3 }
  0x95   :  { %946 = vmatprep.subr.mxu1 %v324_v31 }
  0x96   :  { %11 = vsyncpa [#allocation3], 0  ;;  %872 = vmatpush1.msra.mxu0 %v257_v33  ;;  %947 = vmatpush1.msra.mxu1 %v323_v34  ;;  %v254_v53 = vld [vmem:[%s3049_s3 + $0x298] sm:$0xff]  ;;  %v320_v41 = vld [vmem:[%s3049_s3 + $0x4a8] sm:$0xff]  ;;  %vm1161_vm9 = vcmask 261120   ;;  %vm1243_vm10 = vcmask 31744  }
  0x97   :  { %873 = vmatprep.subr.mxu0 %v256_v35  ;;  %948 = vmatprep.subr.mxu1 %v322_v36  ;;  %v253_v48 = vld [vmem:[%s3049_s3 + $0x290] sm:$0xff]  ;;  %v319_v4 = vld [vmem:[%s3049_s3 + $0x4a0] sm:$0xff]  ;;  %v252_v49 = vld [vmem:[%s3049_s3 + $0x288] sm:$0xff]  ;;  %vm1284_vm11 = vcmask 64512   ;;  %vm1287_vm12 = vcmask 72704   ;;  %s1372_s19 = smov [#allocation2]  }
  0x98   :  { %874 = vmatpush1.msra.mxu0 %v255_v37  ;;  %949 = vmatpush1.msra.mxu1 %v321_v40  ;;  %v318_v50 = vld [vmem:[%s3049_s3 + $0x498] sm:$0xff]  ;;  %v251_v51 = vld [vmem:[%s3049_s3 + $0x280] sm:$0xff]  ;;  %v317_v52 = vld [vmem:[%s3049_s3 + $0x490] sm:$0xff]  ;;  %s1297_s20 = sshll.u32 %s1372_s19, 4  ;;  %s1298_s20 = int_to_ptr.vmem [resolvable:$true] %s1297_s20 }
  0x99   :  { %875 = vmatprep.subr.mxu0 %v254_v53  ;;  %950 = vmatprep.subr.mxu1 %v320_v41  ;;  %v250_v54 = vld [vmem:[%s3049_s3 + $0x278] sm:$0xff]  ;;  %v316_v55 = vld [vmem:[%s3049_s3 + $0x488] sm:$0xff]  ;;  %v249_v57 = vld [vmem:[%s3049_s3 + $0x270] sm:$0xff]  ;;  %s1348_s21 = scalar_lea.vmem %s1298_s20, 256  ;;  %p1353_p1 = scmp.lt.s32.totalorder %s1298_s20, %s1298_s20 }
  0x9a   :  { %876 = vmatpush1.msra.mxu0 %v253_v48  ;;  %951 = vmatpush1.msra.mxu1 %v319_v4  ;;  %v315_v58 = vld [vmem:[%s3049_s3 + $0x480] sm:$0xff]  ;;  %v248_v56 = vld [vmem:[%s3049_s3 + $0x268] sm:$0xff]  ;;  %v314_v59 = vld [vmem:[%s3049_s3 + $0x478] sm:$0xff]  ;;  %p1349_p0 = scmp.ne.s32.totalorder %s1298_s20, %s1348_s21  ;;  %p1354_p2 = scmp.lt.s32.totalorder %s1348_s21, %s1348_s21 }
  0x9b   :  { %877 = vmatprep.subr.mxu0 %v252_v49  ;;  %952 = vmatprep.subr.mxu1 %v318_v50  ;;  %v247_v62 = vld [vmem:[%s3049_s3 + $0x260] sm:$0xff]  ;;  %v313_v7 = vld [vmem:[%s3049_s3 + $0x470] sm:$0xff]  ;;  %v246_v63 = vld [vmem:[%s3049_s3 + $0x258] sm:$0xff] }
  0x9c   :  { %878 = vmatpush1.msra.mxu0 %v251_v51  ;;  %953 = vmatpush1.msra.mxu1 %v317_v52  ;;  %v312_v0 = vld [vmem:[%s3049_s3 + $0x468] sm:$0xff]  ;;  %v245_v42 = vld [vmem:[%s3049_s3 + $0x250] sm:$0xff]  ;;  %v311_v43 = vld [vmem:[%s3049_s3 + $0x460] sm:$0xff]  ;;  %p1355_p3 = por %p1354_p2, %p1353_p1 }
  0x9d   :  { %879 = vmatprep.subr.mxu0 %v250_v54  ;;  %954 = vmatprep.subr.mxu1 %v316_v55  ;;  %v244_v1 = vld [vmem:[%s3049_s3 + $0x248] sm:$0xff]  ;;  %v310_v5 = vld [vmem:[%s3049_s3 + $0x458] sm:$0xff]  ;;  %v243_v6 = vld [vmem:[%s3049_s3 + $0x240] sm:$0xff] }
  0x9e   :  { %880 = vmatpush1.msra.mxu0 %v249_v57  ;;  %955 = vmatpush1.msra.mxu1 %v315_v58  ;;  %v309_v13 = vld [vmem:[%s3049_s3 + $0x450] sm:$0xff]  ;;  %v242_v15 = vld [vmem:[%s3049_s3 + $0x238] sm:$0xff]  ;;  %v308_v9 = vld [vmem:[%s3049_s3 + $0x448] sm:$0xff]  ;;  %p1356_p4 = pnand %p1355_p3, %p1349_p0 }
  0x9f   :  { %881 = vmatprep.subr.mxu0 %v248_v56  ;;  %956 = vmatprep.subr.mxu1 %v314_v59  ;;  %v241_v20 = vld [vmem:[%s3049_s3 + $0x230] sm:$0xff]  ;;  %v307_v11 = vld [vmem:[%s3049_s3 + $0x440] sm:$0xff]  ;;  %v240_v10 = vld [vmem:[%s3049_s3 + $0x228] sm:$0xff] }
  0xa0   :  { %882 = vmatpush1.msra.mxu0 %v247_v62  ;;  %957 = vmatpush1.msra.mxu1 %v313_v7  ;;  %v306_v39 = vld [vmem:[%s3049_s3 + $0x438] sm:$0xff]  ;;  %v239_v46 = vld [vmem:[%s3049_s3 + $0x220] sm:$0xff]  ;;  %v305_v12 = vld [vmem:[%s3049_s3 + $0x430] sm:$0xff] }
  0xa1   :  { %883 = vmatprep.subr.mxu0 %v246_v63  ;;  %958 = vmatprep.subr.mxu1 %v312_v0  ;;  %v238_v16 = vld [vmem:[%s3049_s3 + $0x218] sm:$0xff]  ;;  %v304_v38 = vld [vmem:[%s3049_s3 + $0x428] sm:$0xff]  ;;  %v237_v45 = vld [vmem:[%s3049_s3 + $0x210] sm:$0xff] }
  0xa2   :  { %884 = vmatpush1.msra.mxu0 %v245_v42  ;;  %959 = vmatpush1.msra.mxu1 %v311_v43  ;;  %v303_v14 = vld [vmem:[%s3049_s3 + $0x420] sm:$0xff]  ;;  %v236_v44 = vld [vmem:[%s3049_s3 + $0x208] sm:$0xff]  ;;  %v302_v17 = vld [vmem:[%s3049_s3 + $0x418] sm:$0xff] }
  0xa3   :  { %885 = vmatprep.subr.mxu0 %v244_v1  ;;  %960 = vmatprep.subr.mxu1 %v310_v5  ;;  %v235_v18 = vld [vmem:[%s3049_s3 + $0x200] sm:$0xff]  ;;  %v301_v61 = vld [vmem:[%s3049_s3 + $0x410] sm:$0xff]  ;;  %v298_v2 = vld [vmem:[%s3049_s3 + $0x3f8] sm:$0xff] }
  0xa4   :  { %886 = vmatpush1.msra.mxu0 %v243_v6  ;;  %961 = vmatpush1.msra.mxu1 %v309_v13  ;;  %v300_v26 = vld [vmem:[%s3049_s3 + $0x408] sm:$0xff]  ;;  %v297_v19 = vld [vmem:[%s3049_s3 + $0x3f0] sm:$0xff]  ;;  %v299_v25 = vld [vmem:[%s3049_s3 + $0x400] sm:$0xff] }
  0xa5   :  { %887 = vmatprep.subr.mxu0 %v242_v15  ;;  %962 = vmatprep.subr.mxu1 %v308_v9  ;;  %v296_v21 = vld [vmem:[%s3049_s3 + $0x3e8] sm:$0xff]  ;;  %v362_v22 = vld [vmem:[%s3049_s3 + $0x5f8] sm:$0xff]  ;;  %v295_v23 = vld [vmem:[%s3049_s3 + $0x3e0] sm:$0xff] }
  0xa6   :  { %888 = vmatpush1.msra.mxu0 %v241_v20  ;;  %963 = vmatpush1.msra.mxu1 %v307_v11  ;;  %v361_v24 = vld [vmem:[%s3049_s3 + $0x5f0] sm:$0xff]  ;;  %v294_v27 = vld [vmem:[%s3049_s3 + $0x3d8] sm:$0xff]  ;;  %v360_v28 = vld [vmem:[%s3049_s3 + $0x5e8] sm:$0xff] }
  0xa7   :  { %889 = vmatprep.subr.mxu0 %v240_v10  ;;  %964 = vmatprep.subr.mxu1 %v306_v39  ;;  %v2610_v47 = vpop.xlane.xlu0 %93  ;;  %v293_v8 = vld [vmem:[%s3049_s3 + $0x3d0] sm:$0xff]  ;;  %v359_v29 = vld [vmem:[%s3049_s3 + $0x5e0] sm:$0xff]  ;;  %v292_v60 = vld [vmem:[%s3049_s3 + $0x3c8] sm:$0xff] }
  0xa8   :  { %890 = vmatpush1.msra.mxu0 %v239_v46  ;;  %965 = vmatpush1.msra.mxu1 %v305_v12  ;;  %v358_v30 = vld [vmem:[%s3049_s3 + $0x5d8] sm:$0xff]  ;;  %v291_v3 = vld [vmem:[%s3049_s3 + $0x3c0] sm:$0xff]  ;;  %v357_v31 = vld [vmem:[%s3049_s3 + $0x5d0] sm:$0xff]  ;;  %1316 = vrsqrt.f32 %v2610_v47  ;;  %vm104_vm0 = vcmp.eq.f32.partialorder %v2610_v47, inf  ;;  %vm106_vm2 = vcmp.eq.f32.partialorder %v2610_v47, 0.0 }
  0xa9   :  { %891 = vmatprep.subr.mxu0 %v238_v16  ;;  %966 = vmatprep.subr.mxu1 %v304_v38  ;;  %v290_v32 = vld [vmem:[%s3049_s3 + $0x3b8] sm:$0xff]  ;;  %v356_v33 = vld [vmem:[%s3049_s3 + $0x5c8] sm:$0xff]  ;;  %v289_v35 = vld [vmem:[%s3049_s3 + $0x3b0] sm:$0xff] }
  0xaa   :  { %892 = vmatpush1.msra.mxu0 %v237_v45  ;;  %967 = vmatpush1.msra.mxu1 %v303_v14  ;;  %v355_v36 = vld [vmem:[%s3049_s3 + $0x5c0] sm:$0xff]  ;;  %v288_v37 = vld [vmem:[%s3049_s3 + $0x3a8] sm:$0xff]  ;;  %v354_v40 = vld [vmem:[%s3049_s3 + $0x5b8] sm:$0xff] }
  0xab   :  { %893 = vmatprep.subr.mxu0 %v236_v44  ;;  %968 = vmatprep.subr.mxu1 %v302_v17  ;;  %v287_v41 = vld [vmem:[%s3049_s3 + $0x3a0] sm:$0xff]  ;;  %v353_v48 = vld [vmem:[%s3049_s3 + $0x5b0] sm:$0xff]  ;;  %v286_v4 = vld [vmem:[%s3049_s3 + $0x398] sm:$0xff] }
  0xac   :  { %894 = vmatpush1.msra.mxu0 %v235_v18  ;;  %969 = vmatpush1.msra.mxu1 %v301_v61  ;;  %v2636_v34 = vpop.xlane.xlu1 %100  ;;  %v352_v49 = vld [vmem:[%s3049_s3 + $0x5a8] sm:$0xff]  ;;  %v285_v50 = vld [vmem:[%s3049_s3 + $0x390] sm:$0xff]  ;;  %v351_v51 = vld [vmem:[%s3049_s3 + $0x5a0] sm:$0xff] }
  0xad   :  { %895 = vmatprep.subr.mxu0 %v298_v2  ;;  %970 = vmatprep.subr.mxu1 %v300_v26  ;;  %v284_v52 = vld [vmem:[%s3049_s3 + $0x388] sm:$0xff]  ;;  %v350_v54 = vld [vmem:[%s3049_s3 + $0x598] sm:$0xff]  ;;  %v283_v57 = vld [vmem:[%s3049_s3 + $0x380] sm:$0xff]  ;;  %vm111_vm4 = vcmp.eq.f32.partialorder %v2636_v34, inf  ;;  %vm113_vm6 = vcmp.eq.f32.partialorder %v2636_v34, 0.0 }
  0xae   :  { %896 = vmatpush2.msra.mxu0 %v297_v19  ;;  %971 = vmatpush1.msra.mxu1 %v299_v25  ;;  %v349_v58 = vld [vmem:[%s3049_s3 + $0x590] sm:$0xff]  ;;  %v282_v56 = vld [vmem:[%s3049_s3 + $0x378] sm:$0xff]  ;;  %v348_v59 = vld [vmem:[%s3049_s3 + $0x588] sm:$0xff] }
  0xaf   :  { %897 = vmatprep.subr.mxu0 %v296_v21  ;;  %972 = vmatprep.subr.mxu1 %v362_v22  ;;  %v2650_v53 = vpop.xlane.xlu0 %135  ;;  %v281_v62 = vld [vmem:[%s3049_s3 + $0x370] sm:$0xff]  ;;  %v347_v7 = vld [vmem:[%s3049_s3 + $0x580] sm:$0xff]  ;;  %v280_v63 = vld [vmem:[%s3049_s3 + $0x368] sm:$0xff] }
  0xb0   :  { %898 = vmatpush2.msra.mxu0 %v295_v23  ;;  %973 = vmatpush2.msra.mxu1 %v361_v24  ;;  %1318 = vrsqrt.f32 %v2650_v53  ;;  %v346_v0 = vld [vmem:[%s3049_s3 + $0x578] sm:$0xff]  ;;  %v279_v42 = vld [vmem:[%s3049_s3 + $0x360] sm:$0xff]  ;;  %v345_v43 = vld [vmem:[%s3049_s3 + $0x570] sm:$0xff]  ;;  %vm146_vm1 = vcmp.eq.f32.partialorder %v2650_v53, inf  ;;  %vm148_vm3 = vcmp.eq.f32.partialorder %v2650_v53, 0.0 }
  0xb1   :  { %899 = vmatprep.subr.mxu0 %v294_v27  ;;  %974 = vmatprep.subr.mxu1 %v360_v28  ;;  %1320 = vrsqrt.f32 %v2636_v34  ;;  %v278_v1 = vld [vmem:[%s3049_s3 + $0x358] sm:$0xff]  ;;  %v344_v5 = vld [vmem:[%s3049_s3 + $0x568] sm:$0xff]  ;;  %v277_v6 = vld [vmem:[%s3049_s3 + $0x350] sm:$0xff] }
  0xb2   :  { %900 = vmatpush2.msra.mxu0 %v293_v8  ;;  %975 = vmatpush2.msra.mxu1 %v359_v29  ;;  %v343_v13 = vld [vmem:[%s3049_s3 + $0x560] sm:$0xff]  ;;  %v276_v15 = vld [vmem:[%s3049_s3 + $0x348] sm:$0xff]  ;;  %v342_v9 = vld [vmem:[%s3049_s3 + $0x558] sm:$0xff]  ;;  %v107_v29 = vand.u32 2147483648, %v2610_v47 }
  0xb3   :  { %901 = vmatprep.subr.mxu0 %v292_v60  ;;  %976 = vmatprep.subr.mxu1 %v358_v30  ;;  %v2678_v55 = vpop.xlane.xlu1 %142  ;;  %v275_v20 = vld [vmem:[%s3049_s3 + $0x340] sm:$0xff]  ;;  %v341_v11 = vld [vmem:[%s3049_s3 + $0x550] sm:$0xff]  ;;  %v274_v10 = vld [vmem:[%s3049_s3 + $0x338] sm:$0xff]  ;;  %v149_v60 = vand.u32 2147483648, %v2650_v53 }
  0xb4   :  { %902 = vmatpush2.msra.mxu0 %v291_v3  ;;  %977 = vmatpush2.msra.mxu1 %v357_v31  ;;  %1322 = vrsqrt.f32 %v2678_v55  ;;  %v340_v39 = vld [vmem:[%s3049_s3 + $0x548] sm:$0xff]  ;;  %v273_v46 = vld [vmem:[%s3049_s3 + $0x330] sm:$0xff]  ;;  %v339_v12 = vld [vmem:[%s3049_s3 + $0x540] sm:$0xff]  ;;  %vm153_vm5 = vcmp.eq.f32.partialorder %v2678_v55, inf  ;;  %vm155_vm7 = vcmp.eq.f32.partialorder %v2678_v55, 0.0 }
  0xb5   :  { %903 = vmatprep.subr.mxu0 %v290_v32  ;;  %978 = vmatprep.subr.mxu1 %v356_v33  ;;  %v1317_v16 = vpop.eup %1316  ;;  %v272_v38 = vld [vmem:[%s3049_s3 + $0x328] sm:$0xff]  ;;  %v338_v45 = vld [vmem:[%s3049_s3 + $0x538] sm:$0xff]  ;;  %v271_v44 = vld [vmem:[%s3049_s3 + $0x320] sm:$0xff] }
  0xb6   :  { %904 = vmatpush2.msra.mxu0 %v289_v35  ;;  %979 = vmatpush2.msra.mxu1 %v355_v36  ;;  %v337_v17 = vld [vmem:[%s3049_s3 + $0x530] sm:$0xff]  ;;  %v270_v18 = vld [vmem:[%s3049_s3 + $0x318] sm:$0xff]  ;;  %v336_v61 = vld [vmem:[%s3049_s3 + $0x528] sm:$0xff]  ;;  %v103_v2 = vmul.f32 %v1317_v16, %v2610_v47 }
  0xb7   :  { %905 = vmatprep.subr.mxu0 %v288_v37  ;;  %980 = vmatprep.subr.mxu1 %v354_v40  ;;  %v269_v26 = vld [vmem:[%s3049_s3 + $0x310] sm:$0xff]  ;;  %v335_v19 = vld [vmem:[%s3049_s3 + $0x520] sm:$0xff]  ;;  %v268_v22 = vld [vmem:[%s3049_s3 + $0x308] sm:$0xff] }
  0xb8   :  { %906 = vmatpush2.msra.mxu0 %v287_v41  ;;  %981 = vmatpush2.msra.mxu1 %v353_v48  ;;  %v334_v23 = vld [vmem:[%s3049_s3 + $0x518] sm:$0xff]  ;;  %v267_v27 = vld [vmem:[%s3049_s3 + $0x300] sm:$0xff]  ;;  %v333_v28 = vld [vmem:[%s3049_s3 + $0x510] sm:$0xff]  ;;  %v105_v8 = vsel %vm104_vm0, %v2610_v47, %v103_v2  ;;  %v166_v2 = vlaneseq }
  0xb9   :  { %907 = vmatprep.subr.mxu0 %v286_v4  ;;  %982 = vmatprep.subr.mxu1 %v352_v49  ;;  %v332_v30 = vld [vmem:[%s3049_s3 + $0x508] sm:$0xff]  ;;  %v1048_v3 = vld [vmem:[%s3049_s3 + $0xcf8] sm:$0xff]  ;;  %v331_v36 = vld [vmem:[%s3049_s3 + $0x500] sm:$0xff]  ;;  %v108_v48 = vsel %vm106_vm2, %v107_v29, %v105_v8  ;;  %v114_v4 = vand.u32 2147483648, %v2636_v34 }
  0xba   :  { %908 = vmatpush2.msra.mxu0 %v285_v50  ;;  %983 = vmatpush2.msra.mxu1 %v351_v51  ;;  %v1340_v35 = vld [vmem:[%s3046_s0 + $0x18] sm:$0xff]  ;;  %v1341_v37 = vld [vmem:[%s3046_s0 + $0x10] sm:$0xff]  ;;  %v1046_v41 = vld [vmem:[%s3049_s3 + $0xce8] sm:$0xff]  ;;  %v156_v50 = vand.u32 2147483648, %v2678_v55 }
  0xbb   :  { %909 = vmatprep.subr.mxu0 %v284_v52  ;;  %984 = vmatprep.subr.mxu1 %v350_v54  ;;  %v1047_v40 = vld [vmem:[%s3049_s3 + $0xcf0] sm:$0xff]  ;;  %v1342_v51 = vld [vmem:[%s3046_s0 + $0x28] sm:$0xff]  ;;  %v1045_v52 = vld [vmem:[%s3049_s3 + $0xce0] sm:$0xff] }
  0xbc   :  { %910 = vmatpush2.msra.mxu0 %v283_v57  ;;  %985 = vmatpush2.msra.mxu1 %v349_v58  ;;  %v1343_v54 = vld [vmem:[%s3046_s0 + $0x20] sm:$0xff]  ;;  %v1044_v57 = vld [vmem:[%s3049_s3 + $0xcd8] sm:$0xff]  ;;  %v1344_v58 = vld [vmem:[%s3046_s0 + $0x48] sm:$0xff] }
  0xbd   :  { %911 = vmatprep.subr.mxu0 %v282_v56  ;;  %986 = vmatprep.subr.mxu1 %v348_v59  ;;  %v1319_v14 = vpop.eup %1318  ;;  %v1043_v56 = vld [vmem:[%s3049_s3 + $0xcd0] sm:$0xff]  ;;  %v116_v59 = vmax.f32 %v108_v48, 1e-08  ;;  %v1033_v16 = vld [vmem:[%s3049_s3 + $0xc80] sm:$0xff]  ;;  %v1147_v48 = vld [vmem:[%s3050_s4 + $0x68] sm:$0xff] }
  0xbe   :  { %912 = vmatpush2.msra.mxu0 %v281_v62  ;;  %987 = vmatpush2.msra.mxu1 %v347_v7  ;;  %v1321_v25 = vpop.eup %1320  ;;  %v145_v21 = vmul.f32 %v1319_v14, %v2650_v53  ;;  %v1345_v7 = vld [vmem:[%s3046_s0 + $0x58] sm:$0xff]  ;;  %v1030_v14 = vld [vmem:[%s3049_s3 + $0xc68] sm:$0xff]  ;;  %v1019_v8 = vld [vmem:[%s3049_s3 + $0xc10] sm:$0xff] }
  0xbf   :  { %913 = vmatprep.subr.mxu0 %v280_v63  ;;  %988 = vmatprep.subr.mxu1 %v346_v0  ;;  %v110_v31 = vmul.f32 %v1321_v25, %v2636_v34  ;;  %v1042_v63 = vld [vmem:[%s3049_s3 + $0xcc8] sm:$0xff]  ;;  %v1023_v25 = vld [vmem:[%s3049_s3 + $0xc30] sm:$0xff] }
  0xc0   :  { %914 = vmatpush2.msra.mxu0 %v279_v42  ;;  %989 = vmatpush2.msra.mxu1 %v345_v43  ;;  %v147_v32 = vsel %vm146_vm1, %v2650_v53, %v145_v21  ;;  %v1346_v43 = vld [vmem:[%s3046_s0 + $0x40] sm:$0xff]  ;;  %v1022_v21 = vld [vmem:[%s3049_s3 + $0xc28] sm:$0xff] }
  0xc1   :  { %915 = vmatprep.subr.mxu0 %v278_v1  ;;  %990 = vmatprep.subr.mxu1 %v344_v5  ;;  %v1323_v24 = vpop.eup %1322  ;;  %v150_v49 = vsel %vm148_vm3, %v149_v60, %v147_v32  ;;  %v112_v47 = vsel %vm111_vm4, %v2636_v34, %v110_v31  ;;  %v1041_v1 = vld [vmem:[%s3049_s3 + $0xcc0] sm:$0xff]  ;;  %v1347_v5 = vld [vmem:[%s3046_s0 + $0x50] sm:$0xff]  ;;  %v1040_v34 = vld [vmem:[%s3049_s3 + $0xcb8] sm:$0xff] }
  0xc2   :  { %916 = vmatpush2.msra.mxu0 %v277_v6  ;;  %991 = vmatpush2.msra.mxu1 %v343_v13  ;;  %v152_v33 = vmul.f32 %v1323_v24, %v2678_v55  ;;  %v158_v62 = vmax.f32 %v150_v49, 1e-08  ;;  %v115_v0 = vsel %vm113_vm6, %v114_v4, %v112_v47  ;;  %v1370_v6 = vmov 0.0   ;;  %v1018_v60 = vld [vmem:[%s3049_s3 + $0xc08] sm:$0xff]  ;;  %v1017_v32 = vld [vmem:[%s3049_s3 + $0xc00] sm:$0xff]  ;;  %v1145_v49 = vld [vmem:[%s3050_s4 + $0x58] sm:$0xff] }
  0xc3   :  { %917 = vmatprep.subr.mxu0 %v276_v15  ;;  %992 = vmatprep.subr.mxu1 %v342_v9  ;;  %v117_v13 = vmax.f32 %v115_v0, 1e-08  ;;  %v1146_v4 = vld [vmem:[%s3050_s4 + $0x60] sm:$0xff]  ;;  %v1141_v47 = vld [vmem:[%s3050_s4 + $0x38] sm:$0xff]  ;;  %v1151_v0 = vld [vmem:[%s3050_s4 + $0x88] sm:$0xff] }
  0xc4   :  { %918 = vmatpush2.msra.mxu0 %v275_v20  ;;  %993 = vmatpush2.msra.mxu1 %v341_v11  ;;  %v154_v53 = vsel %vm153_vm5, %v2678_v55, %v152_v33  ;;  %v1039_v55 = vld [vmem:[%s3049_s3 + $0xcb0] sm:$0xff]  ;;  %v160_v9 = vmul.f32 %v158_v62, %v116_v59  ;;  %v1038_v20 = vld [vmem:[%s3049_s3 + $0xca8] sm:$0xff]  ;;  %v1037_v11 = vld [vmem:[%s3049_s3 + $0xca0] sm:$0xff] }
  0xc5   :  { %919 = vmatprep.subr.mxu0 %v274_v10  ;;  %994 = vmatprep.subr.mxu1 %v340_v39  ;;  %v157_v42 = vsel %vm155_vm7, %v156_v50, %v154_v53  ;;  %v1036_v10 = vld [vmem:[%s3049_s3 + $0xc98] sm:$0xff]  ;;  %v1035_v39 = vld [vmem:[%s3049_s3 + $0xc90] sm:$0xff]  ;;  %v1135_v59 = vld [vmem:[%s3050_s4 + $0x8] sm:$0xff] }
  0xc6   :  { %920 = vmatpush2.msra.mxu0 %v273_v46  ;;  %995 = vmatpush2.msra.mxu1 %v339_v12  ;;  %v159_v15 = vmax.f32 %v157_v42, 1e-08  ;;  %1324 = vrcp.f32 %v160_v9  ;;  %v1034_v12 = vld [vmem:[%s3049_s3 + $0xc88] sm:$0xff]  ;;  %v1144_v50 = vld [vmem:[%s3050_s4 + $0x50] sm:$0xff]  ;;  %v1134_v62 = vld [vmem:[%s3050_s4] sm:$0xff] }
  0xc7   :  { %921 = vmatprep.subr.mxu0 %v272_v38  ;;  %996 = vmatprep.subr.mxu1 %v338_v45  ;;  %v1032_v38 = vld [vmem:[%s3049_s3 + $0xc78] sm:$0xff]  ;;  %v1031_v45 = vld [vmem:[%s3049_s3 + $0xc70] sm:$0xff]  ;;  %v1150_v42 = vld [vmem:[%s3050_s4 + $0x80] sm:$0xff] }
  0xc8   :  { %922 = vmatpush2.msra.mxu0 %v271_v44  ;;  %997 = vmatpush2.msra.mxu1 %v337_v17  ;;  %v161_v46 = vmul.f32 %v159_v15, %v117_v13  ;;  %v1029_v44 = vld [vmem:[%s3049_s3 + $0xc60] sm:$0xff]  ;;  %v1028_v17 = vld [vmem:[%s3049_s3 + $0xc58] sm:$0xff]  ;;  %v1140_v53 = vld [vmem:[%s3050_s4 + $0x30] sm:$0xff] }
  0xc9   :  { %923 = vmatprep.subr.mxu0 %v270_v18  ;;  %998 = vmatprep.subr.mxu1 %v336_v61  ;;  %v1027_v18 = vld [vmem:[%s3049_s3 + $0xc50] sm:$0xff]  ;;  %v1026_v61 = vld [vmem:[%s3049_s3 + $0xc48] sm:$0xff] }
  0xca   :  { %924 = vmatpush2.msra.mxu0 %v269_v26  ;;  %999 = vmatpush2.msra.mxu1 %v335_v19  ;;  %1326 = vrcp.f32 %v161_v46  ;;  %v1025_v26 = vld [vmem:[%s3049_s3 + $0xc40] sm:$0xff]  ;;  %v1024_v19 = vld [vmem:[%s3049_s3 + $0xc38] sm:$0xff] }
  0xcb   :  { %925 = vmatprep.subr.mxu0 %v268_v22  ;;  %1000 = vmatprep.subr.mxu1 %v334_v23  ;;  %v167_v23 = vand.u32 127, %v166_v2 }
  0xcc   :  { %926 = vmatpush2.msra.mxu0 %v267_v27  ;;  %927 = vmatprep.mubr.f32.mxu0 %v1340_v35  ;;  %v1021_v27 = vld [vmem:[%s3049_s3 + $0xc20] sm:$0xff] }
  0xcd   :  { %1001 = vmatpush2.msra.mxu1 %v333_v28  ;;  %928 = vmatmul.mubr.f32.vlgmr.msra.gmra.mxu0 %v1341_v37  ;;  %v1020_v28 = vld [vmem:[%s3049_s3 + $0xc18] sm:$0xff]  ;;  %vm168_vm8 = vcmp.eq.s32.totalorder %v167_v23, 9 }
  0xce   :  { %1002 = vmatprep.subr.mxu1 %v332_v30  ;;  %1049 = vmatprep.subr.mxu0 %v1048_v3  ;;  %v68_v24 = vpop.xlane.xlu0 %67  ;;  %v48_v3 = vld [vmem:[%s3048_s2] sm:$0xff] }
  0xcf   :  { %1003 = vmatpush2.msra.mxu1 %v331_v36  ;;  %1004 = vmatprep.mubr.f32.mxu1 %v1342_v51  ;;  %v49_v36 = vld [vmem:[%s3048_s2 + $0x8] sm:$0xff] }
  0xd0   :  { %1050 = vmatpush1.msra.mxu0 %v1047_v40  ;;  %1005 = vmatmul.mubr.f32.vlgmr.msra.gmra.mxu1 %v1343_v54  ;;  %v1149_v40 = vld [vmem:[%s3050_s4 + $0x78] sm:$0xff]  ;;  %v1143_v51 = vld [vmem:[%s3050_s4 + $0x48] sm:$0xff] }
  0xd1   :  { %1051 = vmatprep.subr.mxu0 %v1046_v41  ;;  %933 = vmatprep.mubr.f32.mxu0 %v1344_v58  ;;  %v1148_v41 = vld [vmem:[%s3050_s4 + $0x70] sm:$0xff]  ;;  %v1139_v54 = vld [vmem:[%s3050_s4 + $0x28] sm:$0xff]  ;;  %v1137_v58 = vld [vmem:[%s3050_s4 + $0x18] sm:$0xff] }
  0xd2   :  { %1052 = vmatpush1.msra.mxu0 %v1045_v52  ;;  %1010 = vmatprep.mubr.f32.mxu1 %v1345_v7  ;;  %v75_v31 = vpop.xlane.xlu1 %74  ;;  %v1142_v52 = vld [vmem:[%s3050_s4 + $0x40] sm:$0xff]  ;;  %v1153_v7 = vld [vmem:[%s3050_s4 + $0x98] sm:$0xff] }
  0xd3   :  { %934 = vmatmul.mubr.f32.gmra.mxu0 %v1346_v43  ;;  %1053 = vmatprep.subr.mxu0 %v1044_v57  ;;  %v1325_v22 = vpop.eup %1324  ;;  %v1138_v57 = vld [vmem:[%s3050_s4 + $0x20] sm:$0xff] }
  0xd4   :  { %1054 = vmatpush1.msra.mxu0 %v1043_v56  ;;  %1011 = vmatmul.mubr.f32.gmra.mxu1 %v1347_v5  ;;  %v163_v29 = vmul.f32 %v1325_v22, %v68_v24  ;;  %v1136_v56 = vld [vmem:[%s3050_s4 + $0x10] sm:$0xff] }
  0xd5   :  { %1055 = vmatprep.subr.mxu0 %v1042_v63  ;;  %1113 = vmatprep.mubr.f32.mxu0 %v1370_v6  ;;  %v1152_v63 = vld [vmem:[%s3050_s4 + $0x90] sm:$0xff] }
  0xd6   :  { %1056 = vmatpush1.msra.mxu0 %v1041_v1  ;;  %1168 = vmatprep.subr.mxu1 %v1370_v6  ;;  %v169_v33 = vsel %vm168_vm8, %v163_v29, %v48_v3 }
  0xd7   :  { %1057 = vmatprep.subr.mxu0 %v1040_v34  ;;  %v1327_v30 = vpop.eup %1326  ;;  %1169 = vmatpush1.msra.mxu1 %v1149_v40 }
  0xd8   :  { %1058 = vmatpush1.msra.mxu0 %v1039_v55  ;;  %v165_v35 = vmul.f32 %v1327_v30, %v75_v31  ;;  %1170 = vmatprep.subr.mxu1 %v1370_v6 }
  0xd9   :  { %1059 = vmatprep.subr.mxu0 %v1038_v20  ;;  %1171 = vmatpush1.msra.mxu1 %v1148_v41 }
  0xda   :  { %1060 = vmatpush1.msra.mxu0 %v1037_v11  ;;  %v170_v37 = vsel %vm168_vm8, %v165_v35, %v49_v36  ;;  %1172 = vmatprep.subr.mxu1 %v1370_v6 }
  0xdb   :  { %1061 = vmatprep.subr.mxu0 %v1036_v10  ;;  %1173 = vmatpush1.msra.mxu1 %v1147_v48 }
  0xdc   :  { %1062 = vmatpush1.msra.mxu0 %v1035_v39  ;;  %1174 = vmatprep.subr.mxu1 %v1370_v6 }
  0xdd   :  { %1063 = vmatprep.subr.mxu0 %v1034_v12  ;;  %1175 = vmatpush1.msra.mxu1 %v1146_v4 }
  0xde   :  { %1064 = vmatpush1.msra.mxu0 %v1033_v16  ;;  %1176 = vmatprep.subr.mxu1 %v1370_v6 }
  0xdf   :  { %1065 = vmatprep.subr.mxu0 %v1032_v38  ;;  %1177 = vmatpush1.msra.mxu1 %v1145_v49 }
  0xe0   :  { %1066 = vmatpush1.msra.mxu0 %v1031_v45  ;;  %1178 = vmatprep.subr.mxu1 %v1370_v6 }
  0xe1   :  { %1067 = vmatprep.subr.mxu0 %v1030_v14  ;;  %1179 = vmatpush1.msra.mxu1 %v1144_v50 }
  0xe2   :  { %1068 = vmatpush1.msra.mxu0 %v1029_v44  ;;  %1180 = vmatprep.subr.mxu1 %v1370_v6 }
  0xe3   :  { %1069 = vmatprep.subr.mxu0 %v1028_v17  ;;  %1181 = vmatpush1.msra.mxu1 %v1143_v51 }
  0xe4   :  { %1070 = vmatpush1.msra.mxu0 %v1027_v18  ;;  %1182 = vmatprep.subr.mxu1 %v1370_v6 }
  0xe5   :  { %1071 = vmatprep.subr.mxu0 %v1026_v61  ;;  %1183 = vmatpush1.msra.mxu1 %v1142_v52 }
  0xe6   :  { %1072 = vmatpush1.msra.mxu0 %v1025_v26  ;;  %1184 = vmatprep.subr.mxu1 %v1370_v6 }
  0xe7   :  { %1073 = vmatprep.subr.mxu0 %v1024_v19  ;;  %1185 = vmatpush1.msra.mxu1 %v1141_v47 }
  0xe8   :  { %1074 = vmatpush1.msra.mxu0 %v1023_v25  ;;  %1186 = vmatprep.subr.mxu1 %v1370_v6 }
  0xe9   :  { %1075 = vmatprep.subr.mxu0 %v1022_v21  ;;  %1187 = vmatpush1.msra.mxu1 %v1140_v53 }
  0xea   :  { %1076 = vmatpush1.msra.mxu0 %v1021_v27  ;;  %1188 = vmatprep.subr.mxu1 %v1370_v6 }
  0xeb   :  { %1077 = vmatprep.subr.mxu0 %v1020_v28  ;;  %1189 = vmatpush1.msra.mxu1 %v1139_v54 }
  0xec   :  { %1078 = vmatpush1.msra.mxu0 %v1019_v8  ;;  %1190 = vmatprep.subr.mxu1 %v1370_v6 }
  0xed   :  { %1079 = vmatprep.subr.mxu0 %v1018_v60  ;;  %1191 = vmatpush1.msra.mxu1 %v1138_v57 }
  0xee   :  { %1080 = vmatpush1.msra.mxu0 %v1017_v32  ;;  %1192 = vmatprep.subr.mxu1 %v1370_v6 }
  0xef   :  { %1114 = vmatmul.mubr.f32.vlgmr.msra.gmra.mxu0 %v169_v33  ;;  %1193 = vmatpush1.msra.mxu1 %v1137_v58  ;;  %v1308_v58 = vld [vmem:[%s3051_s5] ss:$0 sm:$0xff]  ;;  %s1371_s5 = smov 124  }
  0xf0   :  { %1119 = vmatprep.mubr.f32.mxu0 %v1370_v6  ;;  %1194 = vmatprep.subr.mxu1 %v1370_v6 }
  0xf1   :  { %1195 = vmatpush1.msra.mxu1 %v1136_v56 }
  0xf2   :  { %1196 = vmatprep.subr.mxu1 %v1370_v6 }
  0xf3   :  { %1120 = vmatmul.mubr.f32.gmra.mxu0 %v170_v37  ;;  %1197 = vmatpush1.msra.mxu1 %v1135_v59 }
  0xf4   :  { %1198 = vmatprep.subr.mxu1 %v1370_v6 }
  0xf5   :  { %1199 = vmatpush1.msra.mxu1 %v1134_v62 }
  0xf6   :  { %1224 = vmatprep.subr.mxu1 %v1370_v6 }
  0xf7   :  { %1225 = vmatpush2.msra.mxu1 %v1153_v7 }
  0xf8   :  { %1226 = vmatprep.subr.mxu1 %v1370_v6 }
  0xf9   :  { %1227 = vmatpush2.msra.mxu1 %v1152_v63 }
  0xfa   :  { %1228 = vmatprep.subr.mxu1 %v1370_v6 }
  0xfb   :  { %1229 = vmatpush2.msra.mxu1 %v1151_v0 }
  0xfc   :  { %1230 = vmatprep.subr.mxu1 %v1370_v6 }
  0xfd   :  { %1231 = vmatpush2.msra.mxu1 %v1150_v42 }
 0x106   :  { %v621_v43 = vpop.f32.mrf.mxu0  ;;  %v698_v5 = vpop.f32.mrf.mxu1 }
 0x107   :  { %v699_v38 = vadd.f32 %v698_v5, %v621_v43 }
 0x108   :  { %v623_v1 = vpop.f32.mrf.mxu0  ;;  %v700_v55 = vpop.f32.mrf.mxu1 }
 0x109   :  { %v701_v14 = vadd.f32 %v700_v55, %v623_v1 }
 0x142   :  { %v627_v34 = vpop.f32.mrf.mxu0 }
 0x143   :  { %v704_v15 = vpop.f32.mrf.mxu1 }
 0x144   :  { %v629_v13 = vpop.f32.mrf.mxu0  ;;  %v705_v2 = vadd.f32 %v704_v15, %v627_v34 }
 0x145   :  { %v706_v20 = vpop.f32.mrf.mxu1 }
 0x146   :  { %v707_v26 = vadd.f32 %v706_v20, %v629_v13 }
 0x149   :  { %v775_v9 = vpop.f32.mrf.mxu0 }
 0x14a   :  { %v776_v44 = vadd.f32 %v775_v9, %v699_v38 }
 0x14b   :  { %v777_v11 = vpop.f32.mrf.mxu0 }
 0x14c   :  { %v852_v10 = vpop.f32.mrf.mxu1  ;;  %v778_v61 = vadd.f32 %v777_v11, %v701_v14 }
 0x14d   :  { %v853_v19 = vadd.f32 %v852_v10, %v776_v44 }
 0x14e   :  { %v854_v46 = vpop.f32.mrf.mxu1 }
 0x14f   :  { %v781_v39 = vpop.f32.mrf.mxu0  ;;  %v855_v23 = vadd.f32 %v854_v46, %v778_v61 }
 0x150   :  { %v782_v25 = vadd.f32 %v781_v39, %v705_v2 }
 0x151   :  { %v783_v12 = vpop.f32.mrf.mxu0 }
 0x152   :  { %v858_v6 = vpop.f32.mrf.mxu1  ;;  %v784_v24 = vadd.f32 %v783_v12, %v707_v26 }
 0x153   :  { %v859_v8 = vadd.f32 %v858_v6, %v782_v25 }
 0x154   :  { %v860_v45 = vpop.f32.mrf.mxu1 }
 0x155   :  { %v861_v30 = vadd.f32 %v860_v45, %v784_v24 }
 0x18d   :  { %v929_v16 = vpop.f32.mrf.mxu0 }
 0x18e   :  { %v930_v27 = vadd.f32 %v929_v16, %v853_v19 }
 0x18f   :  { %v931_v17 = vpop.f32.mrf.mxu0 }
 0x190   :  { %v1006_v18 = vpop.f32.mrf.mxu1  ;;  %v932_v28 = vadd.f32 %v931_v17, %v855_v23 }
 0x191   :  { %v1007_v3 = vadd.f32 %v1006_v18, %v930_v27 }
 0x192   :  { %v1008_v22 = vpop.f32.mrf.mxu1 }
 0x193   :  { %v935_v21 = vpop.f32.mrf.mxu0  ;;  %v1009_v33 = vadd.f32 %v1008_v22, %v932_v28 }
 0x194   :  { %v1012_v60 = vpop.f32.mrf.mxu1  ;;  %v936_v31 = vadd.f32 %v935_v21, %v859_v8 }
 0x195   :  { %v937_v29 = vpop.f32.mrf.mxu0 }
 0x196   :  { %v938_v35 = vadd.f32 %v937_v29, %v861_v30  ;;  %v1014_v36 = vpop.f32.mrf.mxu1  ;;  %v1013_v48 = vadd.f32 %v1012_v60, %v936_v31 }
 0x198   :  { %v1015_v49 = vadd.f32 %v1014_v36, %v938_v35 }
 0x1af   :  { %v1115_v32 = vpop.f32.mrf.mxu0 }
 0x1b0   :  { %v1126_v37 = vadd.f32 %v1115_v32, %v1007_v3 }
 0x1b1   :  { %v1117_v40 = vpop.f32.mrf.mxu0 }
 0x1b2   :  { %v1127_v41 = vadd.f32 %v1117_v40, %v1009_v33  ;;  %v1130_v51 = vmax.f32 %v1126_v37, 0.0 }
 0x1b3   :  { %v1121_v4 = vpop.f32.mrf.mxu0 }
 0x1b4   :  { %v1131_v50 = vmax.f32 %v1127_v41, 0.0  ;;  %v1128_v52 = vadd.f32 %v1121_v4, %v1013_v48 }
 0x1b5   :  { %v1123_v47 = vpop.f32.mrf.mxu0 }
 0x1b6   :  { %v1129_v53 = vadd.f32 %v1123_v47, %v1015_v49  ;;  %1309 = vmatprep.mubr.msk.f32.mxu1 %vm1161_vm9, %v1131_v50  ;;  %v1132_v57 = vmax.f32 %v1128_v52, 0.0 }
 0x1b7   :  { %1233 = vmatmul.mubr.f32.vlgmr.msra.gmra.mxu1 %v1130_v51 }
 0x1b8   :  { %v1133_v54 = vmax.f32 %v1129_v53, 0.0 }
 0x1ba   :  { %1310 = vmatprep.mubr.msk.f32.mxu1 %vm1161_vm9, %v1133_v54 }
 0x1bb   :  { %1238 = vmatmul.mubr.f32.gmra.mxu1 %v1132_v57 }
 0x277   :  { %v1234_v56 = vpop.f32.mrf.mxu1 }
 0x278   :  { %v1235_v59 = vadd.f32 %v1308_v58, %v1234_v56 }
 0x279   :  { %v1236_v62 = vpop.f32.mrf.mxu1 }
 0x27a   :  { %v1244_v7 = vsel %vm1243_vm10, %v1235_v59, -inf }
 0x27b   :  { %1245 = vmax.xlane.f32.xlu0 %v1244_v7  ;;  %v1239_v63 = vpop.f32.mrf.mxu1 }
 0x27c   :  { %v1240_v0 = vadd.f32 %v1308_v58, %v1239_v63 }
 0x27d   :  { %v1241_v42 = vpop.f32.mrf.mxu1 }
 0x27e   :  { %v1247_v43 = vsel %vm1243_vm10, %v1240_v0, -inf }
 0x27f   :  { %1248 = vmax.xlane.f32.xlu1 %v1247_v43 }
 0x304   :  { %v1246_v1 = vpop.xlane.xlu0 %1245 }
 0x305   :  { %v1250_v5 = vsub.f32 %v1235_v59, %v1246_v1 }
 0x307   :  { %v1252_v34 = vmul.f32 1.442695, %v1250_v5 }
 0x308   :  { %v1249_v55 = vpop.xlane.xlu1 %1248 }
 0x309   :  { %1328 = vpow2.f32 %v1252_v34  ;;  %v1251_v13 = vsub.f32 %v1240_v0, %v1249_v55 }
 0x30b   :  { %v1254_v15 = vmul.f32 1.442695, %v1251_v13 }
 0x30d   :  { %1330 = vpow2.f32 %v1254_v15 }
 0x316   :  { %v1329_v9 = vpop.eup %1328 }
 0x317   :  { %v1256_v20 = vsel %vm1243_vm10, %v1329_v9, 0.0 }
 0x318   :  { %1257 = vadd.xlane.f32.xlu0 %v1256_v20 }
 0x31a   :  { %v1331_v11 = vpop.eup %1330 }
 0x31b   :  { %v1259_v10 = vsel %vm1243_vm10, %v1331_v11, 0.0 }
 0x31c   :  { %1260 = vadd.xlane.f32.xlu1 %v1259_v10 }
 0x32d   :  { %1270 = vrot.lane.b32.xlu1 %v1240_v0, %s1371_s5 }
 0x32e   :  { %1268 = vrot.lane.b32.xlu0 %v1235_v59, %s1371_s5 }
 0x3a1   :  { %v1258_v39 = vpop.xlane.xlu0 %1257 }
 0x3a2   :  { %1332 = vrcp.f32 %v1258_v39 }
 0x3a5   :  { %v1261_v46 = vpop.xlane.xlu1 %1260  ;;  %v1269_v16 = vpop.permute.xlu0 %1268 }
 0x3a6   :  { %1334 = vrcp.f32 %v1261_v46 }
 0x3a9   :  { %v1271_v17 = vpop.permute.xlu1 %1270 }
 0x3af   :  { %v1333_v12 = vpop.eup %1332 }
 0x3b0   :  { %v1263_v6 = vmul.f32 %v1333_v12, %v1329_v9 }
 0x3b2   :  { %v1274_v38 = vmul.f32 %v1269_v16, %v1263_v6  ;;  %v1282_v2 = vsel %vm1243_vm10, %v1263_v6, %v1235_v59 }
 0x3b3   :  { %v1335_v45 = vpop.eup %1334 }
 0x3b4   :  { %v1265_v14 = vmul.f32 %v1335_v45, %v1331_v11  ;;  %v1276_v44 = vsel %vm1243_vm10, %v1274_v38, 0.0 }
 0x3b5   :  { %1277 = vadd.xlane.f32.xlu1 %v1276_v44 }
 0x3b6   :  { %v1275_v18 = vmul.f32 %v1271_v17, %v1265_v14  ;;  %v1283_v21 = vsel %vm1243_vm10, %v1265_v14, %v1240_v0 }
 0x3b8   :  { %v1279_v61 = vsel %vm1243_vm10, %v1275_v18, 0.0 }
 0x3b9   :  { %1280 = vadd.xlane.f32.xlu0 %v1279_v61 }
 0x43e   :  { %v1278_v26 = vpop.xlane.xlu1 %1277 }
 0x43f   :  { %v1285_v19 = vsel %vm1284_vm11, %v1282_v2, %v1278_v26 }
 0x440   :  { %v1288_v25 = vsel %vm1287_vm12, %v1285_v19, 0.0 }
 0x441   :  { %1290 = vst [vmem:[#allocation2] sm:$0xff] %v1288_v25 }
 0x442   :  { %v1281_v22 = vpop.xlane.xlu0 %1280 }
 0x443   :  { %v1286_v23 = vsel %vm1284_vm11, %v1283_v21, %v1281_v22 }
 0x444   :  { %v1289_v24 = vsel %vm1287_vm12, %v1286_v23, 0.0 }
 0x445   :  { %1291 = vst [vmem:[#allocation2 + $0x8] sm:$0xff] %v1289_v24 }
 0x446   :  { %1359 = shalt.err (!%p1356_p4)
}
 0x447   :  { %s1373_s22 = smov 128   ;;  %s1374_s23 = smov 8  }
 0x448   :  { %1303 = dma.vmem_to_hbm [thread:$0]  %s1298_s20, 256, %s3052_s6, [#allocation3], %s1373_s22, %s1373_s22, %s1374_s23  }
 0x449   :  { %1368 = dma.done.wait [#allocation3], 256  }
 0x44a   :  { %1369 = vsyncadd [#allocation3], 4294967040 }
 0x44b   :  { %1307 = vsyncpa [#allocation3], 1 }

</bundles_post_ra>
